<compile_context>
chip_gen: v7x
topology: tpu7x:2x2x1
jax: 0.10.0
libtpu: 0.0.40
codegen_flags: <defaults>
</compile_context>

<pallas_src>
import functools
import jax
import jax.numpy as jnp
from jax.experimental import pallas as pl
from jax.experimental.pallas import tpu as pltpu


def _tree_sum(terms):
    """Pairwise (tree) summation -- shorter dependency chains than a linear fold."""
    terms = list(terms)
    while len(terms) > 1:
        nxt = [terms[i] + terms[i + 1] for i in range(0, len(terms) - 1, 2)]
        if len(terms) % 2:
            nxt.append(terms[-1])
        terms = nxt
    return terms[0]


def _layer_block_kernel(w1_ref, wk_ref, bias_ref, x_ref, out_ref, *,
                        k_size, Wp, s1h, compute_dtype):
    # w1_ref  : [C_out, C_in]          SMEM  (1x1-conv weights)
    # wk_ref  : [C_out, C_in*k]        SMEM  ((1,k)-conv weights, flattened)
    # bias_ref: [C_out]                SMEM  (b1 + bk, folded)
    # x_ref   : [C_in, 2, Wh, TN]      VMEM  (even/odd pre-interleaved width)
    # out_ref : [C_out, Wp, TN]        VMEM
    C_in = x_ref.shape[0]
    C_out = out_ref.shape[0]
    cdt = compute_dtype

    # Load + even/odd split once per grid step (contiguous loads only; the
    # wrapper pre-interleaved even/odd width positions on a size-2 axis).
    xe = [x_ref[i, 0, :, :].astype(cdt) for i in range(C_in)]   # [Wh, TN]
    xo = [x_ref[i, 1, :, :].astype(cdt) for i in range(C_in)]   # [Wh, TN]

    # Hoist all shifted slabs once (shared by every output channel).
    # conv1[t] = sum_{i,j} wk[o,i,j] * x[i, t+j]
    #   even t = 2p (p = 0..Wp)     -> slab_a[(i,j)] : [Wp+1, TN]
    #   odd  t = 2p+1 (p = 0..Wp-1) -> slab_b[(i,j)] : [Wp,   TN]
    slab_a = []
    slab_b = []
    for i in range(C_in):
        for j in range(k_size):
            m = j // 2
            if j % 2 == 0:
                slab_a.append(xe[i][m:m + Wp + 1, :])
                slab_b.append(xo[i][m:m + Wp, :])
            else:
                slab_a.append(xo[i][m:m + Wp + 1, :])
                slab_b.append(xe[i][m + 1:m + 1 + Wp, :])
    # 1x1 stride-2 conv tail positions are exactly xe[:, s1h : s1h+Wp, :].
    tail = [xe[i][s1h:s1h + Wp, :] for i in range(C_in)]

    nw = C_in * k_size
    for o in range(C_out):
        # Read each SMEM scalar once per channel (reused by even & odd sums).
        wks = [wk_ref[o, t].astype(cdt) for t in range(nw)]
        w1s = [w1_ref[o, i].astype(cdt) for i in range(C_in)]
        b_o = bias_ref[o].astype(cdt)

        a = _tree_sum([wks[t] * slab_a[t] for t in range(nw)])   # [Wp+1, TN]
        b = _tree_sum([wks[t] * slab_b[t] for t in range(nw)])   # [Wp,   TN]
        # MaxPool2d((1,3), stride (1,2)): pooled[p] = max(c1[2p], c1[2p+1], c1[2p+2])
        pooled = jnp.maximum(jnp.maximum(a[:Wp, :], b), a[1:, :])
        # conv_output (1x1, stride 2) only at the last Wp output positions.
        y1 = _tree_sum([w1s[i] * tail[i] for i in range(C_in)])
        out_ref[o, :, :] = jnp.maximum(pooled + y1 + b_o, 0.0).astype(out_ref.dtype)


def _round_up(a, b):
    return (a + b - 1) // b * b


def _device_kind():
    try:
        return jax.devices()[0].device_kind.lower()
    except Exception:
        return ""


def _pick_compute_dtype(x_dtype):
    # bf16 compute only when the input is bf16 AND the VPU supports bf16
    # (v6e / v7x).  On v5e (no bf16 VALU) we keep f32 compute.
    if jnp.dtype(x_dtype) == jnp.dtype(jnp.bfloat16):
        kind = _device_kind()
        if ("v6" in kind) or ("v7" in kind):
            return jnp.bfloat16
    return jnp.float32


def layer_block_forward(x_nchw, w1, b1, wk, bk, *, k_size,
                        lane_tile=8192, vmem_block_budget=20 * 1024 * 1024):
    """Forward pass of DCdetector layer_block.

    x_nchw: [B, C_in, H, W]
    w1    : [C_out, C_in]     (Conv2d(c_in,c_out,(1,1),stride=(1,2)) weight, squeezed)
    b1    : [C_out]
    wk    : [C_out, C_in, k]  (Conv2d(c_in,c_out,(1,k)) weight, squeezed)
    bk    : [C_out]
    returns [B, C_out, H, Wp]
    """
    B, C_in, H, W = x_nchw.shape
    C_out = w1.shape[0]
    assert wk.shape == (C_out, C_in, k_size)
    assert W >= k_size + 2, "need W - k + 1 >= 3 so the (1,3) maxpool is non-empty"

    W_s = (W - 1) // 2 + 1          # width of conv_output (1x1, stride 2)
    W1 = W - k_size + 1             # width of conv_output1 (valid (1,k) conv)
    Wp = (W1 - 3) // 2 + 1          # width of maxpool output
    s1h = W_s - Wp                  # even-position offset of conv_output tail

    # Pad W to even so the even/odd interleave is a pure minor-dim reshape.
    W_ev = W + (W % 2)
    Wh = W_ev // 2
    N = B * H

    # Static extent checks for the even/odd slab slices (covers all W/k parities).
    req = s1h + Wp
    for j in range(k_size):
        m = j // 2
        if j % 2 == 0:
            req = max(req, m + Wp + 1, m + Wp)
        else:
            req = max(req, m + Wp + 1, m + 1 + Wp)
    assert req <= Wh, ("even/odd slab extent exceeds padded half-width", req, Wh)

    compute_dtype = _pick_compute_dtype(x_nchw.dtype)

    # --- lane-tile auto-sizing against a VMEM budget (padded sublane dims) ---
    in_isz = jnp.dtype(x_nchw.dtype).itemsize
    cdt_isz = jnp.dtype(compute_dtype).itemsize
    Wh_p = _round_up(Wh, 8)
    Wp_p = _round_up(Wp, 8)
    per_lane = (
        2 * (C_in * 2 * Wh_p * in_isz + C_out * Wp_p * in_isz)       # dbl-buffered blocks
        + int(1.5 * (C_in * 2 * Wh_p                                 # xe/xo values
                     + C_in * k_size * (2 * Wp + 1)                  # shifted slabs
                     + 4 * (Wp + 1)) * cdt_isz))                     # accumulators / temps
    tn_fit = max(128, (vmem_block_budget // max(per_lane, 1)) // 128 * 128)
    tn_cap = max(128, min(lane_tile, tn_fit))

    N_128 = _round_up(N, 128)
    # v7x has 2 TensorCores: keep >=2 grid steps when there is enough work.
    min_steps = 2 if ("v7" in _device_kind() and N_128 >= 256) else 1
    steps = max(min_steps, pl.cdiv(N_128, tn_cap))
    TN = _round_up(pl.cdiv(N_128, steps), 128)
    steps = pl.cdiv(N_128, TN)
    N_pad = steps * TN

    # --- single-copy re-layout: NCHW -> [C_in, 2, Wh, N] (even/odd interleaved) ---
    x_p = x_nchw
    if W_ev != W:
        x_p = jnp.pad(x_p, ((0, 0), (0, 0), (0, 0), (0, 1)))
    # reshape (minor split) is free, the transpose is the single data copy,
    # the trailing reshape (collapse adjacent B,H) is free.
    x_eo = jnp.transpose(x_p.reshape(B, C_in, H, Wh, 2),
                         (1, 4, 3, 0, 2)).reshape(C_in, 2, Wh, N)
    if N_pad != N:
        x_eo = jnp.pad(x_eo, ((0, 0), (0, 0), (0, 0), (0, N_pad - N)))

    w1_f = w1.astype(jnp.float32)
    wk_flat = wk.astype(jnp.float32).reshape(C_out, C_in * k_size)
    bias = (b1 + bk).astype(jnp.float32)   # pooling is invariant to per-channel const

    kernel = functools.partial(_layer_block_kernel, k_size=k_size, Wp=Wp,
                               s1h=s1h, compute_dtype=compute_dtype)

    out_cwn = pl.pallas_call(
        kernel,
        out_shape=jax.ShapeDtypeStruct((C_out, Wp, N_pad), x_nchw.dtype),
        grid_spec=pltpu.PrefetchScalarGridSpec(
            num_scalar_prefetch=0,
            grid=(N_pad // TN,),
            in_specs=[
                pl.BlockSpec(memory_space=pltpu.MemorySpace.SMEM),        # w1
                pl.BlockSpec(memory_space=pltpu.MemorySpace.SMEM),        # wk (flat)
                pl.BlockSpec(memory_space=pltpu.MemorySpace.SMEM),        # bias
                pl.BlockSpec((C_in, 2, Wh, TN), lambda n: (0, 0, 0, n)),  # x (even/odd)
            ],
            out_specs=pl.BlockSpec((C_out, Wp, TN), lambda n: (0, 0, n)),
        ),
        compiler_params=pltpu.CompilerParams(
            dimension_semantics=("parallel",),
            vmem_limit_bytes=32 * 1024 * 1024,
        ),
    )(w1_f, wk_flat, bias, x_eo)

    # TODO(synk): downstream consumers could take the lane-dense [C_out, Wp, N]
    # layout directly and skip this final transpose copy.
    out_cwn = out_cwn[:, :, :N]
    return jnp.transpose(out_cwn.reshape(C_out, Wp, B, H), (2, 0, 3, 1))


def _reference(x, w1, b1, wk, bk, k_size):
    """Plain-JAX NCHW reference matching the PyTorch forward."""
    B, C_in, H, W = x.shape
    W_s = (W - 1) // 2 + 1
    W1 = W - k_size + 1
    Wp = (W1 - 3) // 2 + 1
    xs = x[:, :, :, 0:2 * (W_s - 1) + 1:2]
    conv_out = jnp.einsum('bihw,oi->bohw', xs, w1) + b1[None, :, None, None]
    conv1 = bk[None, :, None, None] + sum(
        jnp.einsum('bihw,oi->bohw', x[:, :, :, j:j + W1], wk[:, :, j])
        for j in range(k_size))
    pool = jnp.max(jnp.stack([conv1[..., d:d + 2 * (Wp - 1) + 1:2]
                              for d in range(3)], axis=0), axis=0)
    return jnp.maximum(pool + conv_out[..., -Wp:], 0.0)


if __name__ == "__main__":
    key = jax.random.PRNGKey(0)
    B, C_in, C_out, H, W, k_size = 2, 4, 8, 8, 16, 3
    k_x, k_w1, k_b1, k_wk, k_bk = jax.random.split(key, 5)

    x = jax.random.normal(k_x, (B, C_in, H, W), jnp.float32)
    # Deterministic synthetic parameters (nn.Conv2d weight shapes squeezed:
    # w1 = [C_out, C_in] for the (1,1) conv, wk = [C_out, C_in, k] for (1,k)).
    w1 = jax.random.normal(k_w1, (C_out, C_in), jnp.float32) * 0.5
    b1 = jax.random.normal(k_b1, (C_out,), jnp.float32) * 0.1
    wk = jax.random.normal(k_wk, (C_out, C_in, k_size), jnp.float32) * 0.5
    bk = jax.random.normal(k_bk, (C_out,), jnp.float32) * 0.1

    out = layer_block_forward(x, w1, b1, wk, bk, k_size=k_size)
    out = jax.block_until_ready(out)

    ref = _reference(x, w1, b1, wk, bk, k_size)
    assert out.shape == ref.shape, (out.shape, ref.shape)
    assert jnp.allclose(out, ref, atol=1e-4, rtol=1e-4), \
        float(jnp.max(jnp.abs(out - ref)))
    print("KERNEL_OK")
</pallas_src>

<mosaic_0001>
module attributes {stable_mosaic.version = 11 : i64} {
  func.func @_layer_block_kernel(%arg0: i32, %arg1: memref<8x4xf32, #tpu.memory_space<smem>>, %arg2: memref<8x12xf32, #tpu.memory_space<smem>>, %arg3: memref<8xf32, #tpu.memory_space<smem>>, %arg4: memref<4x2x8x128xf32, #tpu.memory_space<vmem>>, %arg5: memref<8x6x128xf32, #tpu.memory_space<vmem>>) attributes {dimension_semantics = [#tpu.dimension_semantics<parallel>], iteration_bounds = array<i64: 1>, scalar_prefetch = 0 : i64, scratch_operands = 0 : i64, tpu.core_type = #tpu.core_type<tc>, window_params = [{transform_indices = @transform_0, window_bounds = array<i64: 8, 4>}, {transform_indices = @transform_1, window_bounds = array<i64: 8, 12>}, {transform_indices = @transform_2, window_bounds = array<i64: 8>}, {transform_indices = @transform_3, window_bounds = array<i64: 4, 2, 8, 128>}, {transform_indices = @transform_4, window_bounds = array<i64: 8, 6, 128>}]} {
    %c0 = arith.constant 0 : index
    %c0_0 = arith.constant 0 : index
    %c0_1 = arith.constant 0 : index
    %c0_2 = arith.constant 0 : index
    %0 = vector.load %arg4[%c0, %c0_0, %c0_1, %c0_2] : memref<4x2x8x128xf32, #tpu.memory_space<vmem>>, vector<1x1x8x128xf32>
    %1 = vector.shape_cast %0 : vector<1x1x8x128xf32> to vector<8x128xf32>
    %c1 = arith.constant 1 : index
    %c0_3 = arith.constant 0 : index
    %c0_4 = arith.constant 0 : index
    %c0_5 = arith.constant 0 : index
    %2 = vector.load %arg4[%c1, %c0_3, %c0_4, %c0_5] : memref<4x2x8x128xf32, #tpu.memory_space<vmem>>, vector<1x1x8x128xf32>
    %3 = vector.shape_cast %2 : vector<1x1x8x128xf32> to vector<8x128xf32>
    %c2 = arith.constant 2 : index
    %c0_6 = arith.constant 0 : index
    %c0_7 = arith.constant 0 : index
    %c0_8 = arith.constant 0 : index
    %4 = vector.load %arg4[%c2, %c0_6, %c0_7, %c0_8] : memref<4x2x8x128xf32, #tpu.memory_space<vmem>>, vector<1x1x8x128xf32>
    %5 = vector.shape_cast %4 : vector<1x1x8x128xf32> to vector<8x128xf32>
    %c3 = arith.constant 3 : index
    %c0_9 = arith.constant 0 : index
    %c0_10 = arith.constant 0 : index
    %c0_11 = arith.constant 0 : index
    %6 = vector.load %arg4[%c3, %c0_9, %c0_10, %c0_11] : memref<4x2x8x128xf32, #tpu.memory_space<vmem>>, vector<1x1x8x128xf32>
    %7 = vector.shape_cast %6 : vector<1x1x8x128xf32> to vector<8x128xf32>
    %c0_12 = arith.constant 0 : index
    %c1_13 = arith.constant 1 : index
    %c0_14 = arith.constant 0 : index
    %c0_15 = arith.constant 0 : index
    %8 = vector.load %arg4[%c0_12, %c1_13, %c0_14, %c0_15] : memref<4x2x8x128xf32, #tpu.memory_space<vmem>>, vector<1x1x8x128xf32>
    %9 = vector.shape_cast %8 : vector<1x1x8x128xf32> to vector<8x128xf32>
    %c1_16 = arith.constant 1 : index
    %c1_17 = arith.constant 1 : index
    %c0_18 = arith.constant 0 : index
    %c0_19 = arith.constant 0 : index
    %10 = vector.load %arg4[%c1_16, %c1_17, %c0_18, %c0_19] : memref<4x2x8x128xf32, #tpu.memory_space<vmem>>, vector<1x1x8x128xf32>
    %11 = vector.shape_cast %10 : vector<1x1x8x128xf32> to vector<8x128xf32>
    %c2_20 = arith.constant 2 : index
    %c1_21 = arith.constant 1 : index
    %c0_22 = arith.constant 0 : index
    %c0_23 = arith.constant 0 : index
    %12 = vector.load %arg4[%c2_20, %c1_21, %c0_22, %c0_23] : memref<4x2x8x128xf32, #tpu.memory_space<vmem>>, vector<1x1x8x128xf32>
    %13 = vector.shape_cast %12 : vector<1x1x8x128xf32> to vector<8x128xf32>
    %c3_24 = arith.constant 3 : index
    %c1_25 = arith.constant 1 : index
    %c0_26 = arith.constant 0 : index
    %c0_27 = arith.constant 0 : index
    %14 = vector.load %arg4[%c3_24, %c1_25, %c0_26, %c0_27] : memref<4x2x8x128xf32, #tpu.memory_space<vmem>>, vector<1x1x8x128xf32>
    %15 = vector.shape_cast %14 : vector<1x1x8x128xf32> to vector<8x128xf32>
    %16 = vector.extract_strided_slice %1 {offsets = [0, 0], sizes = [7, 128], strides = [1, 1]} : vector<8x128xf32> to vector<7x128xf32>
    %17 = vector.extract_strided_slice %9 {offsets = [0, 0], sizes = [6, 128], strides = [1, 1]} : vector<8x128xf32> to vector<6x128xf32>
    %18 = vector.extract_strided_slice %9 {offsets = [0, 0], sizes = [7, 128], strides = [1, 1]} : vector<8x128xf32> to vector<7x128xf32>
    %19 = vector.extract_strided_slice %1 {offsets = [1, 0], sizes = [6, 128], strides = [1, 1]} : vector<8x128xf32> to vector<6x128xf32>
    %20 = vector.extract_strided_slice %1 {offsets = [1, 0], sizes = [7, 128], strides = [1, 1]} : vector<8x128xf32> to vector<7x128xf32>
    %21 = vector.extract_strided_slice %9 {offsets = [1, 0], sizes = [6, 128], strides = [1, 1]} : vector<8x128xf32> to vector<6x128xf32>
    %22 = vector.extract_strided_slice %3 {offsets = [0, 0], sizes = [7, 128], strides = [1, 1]} : vector<8x128xf32> to vector<7x128xf32>
    %23 = vector.extract_strided_slice %11 {offsets = [0, 0], sizes = [6, 128], strides = [1, 1]} : vector<8x128xf32> to vector<6x128xf32>
    %24 = vector.extract_strided_slice %11 {offsets = [0, 0], sizes = [7, 128], strides = [1, 1]} : vector<8x128xf32> to vector<7x128xf32>
    %25 = vector.extract_strided_slice %3 {offsets = [1, 0], sizes = [6, 128], strides = [1, 1]} : vector<8x128xf32> to vector<6x128xf32>
    %26 = vector.extract_strided_slice %3 {offsets = [1, 0], sizes = [7, 128], strides = [1, 1]} : vector<8x128xf32> to vector<7x128xf32>
    %27 = vector.extract_strided_slice %11 {offsets = [1, 0], sizes = [6, 128], strides = [1, 1]} : vector<8x128xf32> to vector<6x128xf32>
    %28 = vector.extract_strided_slice %5 {offsets = [0, 0], sizes = [7, 128], strides = [1, 1]} : vector<8x128xf32> to vector<7x128xf32>
    %29 = vector.extract_strided_slice %13 {offsets = [0, 0], sizes = [6, 128], strides = [1, 1]} : vector<8x128xf32> to vector<6x128xf32>
    %30 = vector.extract_strided_slice %13 {offsets = [0, 0], sizes = [7, 128], strides = [1, 1]} : vector<8x128xf32> to vector<7x128xf32>
    %31 = vector.extract_strided_slice %5 {offsets = [1, 0], sizes = [6, 128], strides = [1, 1]} : vector<8x128xf32> to vector<6x128xf32>
    %32 = vector.extract_strided_slice %5 {offsets = [1, 0], sizes = [7, 128], strides = [1, 1]} : vector<8x128xf32> to vector<7x128xf32>
    %33 = vector.extract_strided_slice %13 {offsets = [1, 0], sizes = [6, 128], strides = [1, 1]} : vector<8x128xf32> to vector<6x128xf32>
    %34 = vector.extract_strided_slice %7 {offsets = [0, 0], sizes = [7, 128], strides = [1, 1]} : vector<8x128xf32> to vector<7x128xf32>
    %35 = vector.extract_strided_slice %15 {offsets = [0, 0], sizes = [6, 128], strides = [1, 1]} : vector<8x128xf32> to vector<6x128xf32>
    %36 = vector.extract_strided_slice %15 {offsets = [0, 0], sizes = [7, 128], strides = [1, 1]} : vector<8x128xf32> to vector<7x128xf32>
    %37 = vector.extract_strided_slice %7 {offsets = [1, 0], sizes = [6, 128], strides = [1, 1]} : vector<8x128xf32> to vector<6x128xf32>
    %38 = vector.extract_strided_slice %7 {offsets = [1, 0], sizes = [7, 128], strides = [1, 1]} : vector<8x128xf32> to vector<7x128xf32>
    %39 = vector.extract_strided_slice %15 {offsets = [1, 0], sizes = [6, 128], strides = [1, 1]} : vector<8x128xf32> to vector<6x128xf32>
    %40 = vector.extract_strided_slice %1 {offsets = [2, 0], sizes = [6, 128], strides = [1, 1]} : vector<8x128xf32> to vector<6x128xf32>
    %41 = vector.extract_strided_slice %3 {offsets = [2, 0], sizes = [6, 128], strides = [1, 1]} : vector<8x128xf32> to vector<6x128xf32>
    %42 = vector.extract_strided_slice %5 {offsets = [2, 0], sizes = [6, 128], strides = [1, 1]} : vector<8x128xf32> to vector<6x128xf32>
    %43 = vector.extract_strided_slice %7 {offsets = [2, 0], sizes = [6, 128], strides = [1, 1]} : vector<8x128xf32> to vector<6x128xf32>
    %c0_28 = arith.constant 0 : index
    %c0_29 = arith.constant 0 : index
    %44 = memref.load %arg2[%c0_28, %c0_29] : memref<8x12xf32, #tpu.memory_space<smem>>
    %c0_30 = arith.constant 0 : index
    %c1_31 = arith.constant 1 : index
    %45 = memref.load %arg2[%c0_30, %c1_31] : memref<8x12xf32, #tpu.memory_space<smem>>
    %c0_32 = arith.constant 0 : index
    %c2_33 = arith.constant 2 : index
    %46 = memref.load %arg2[%c0_32, %c2_33] : memref<8x12xf32, #tpu.memory_space<smem>>
    %c0_34 = arith.constant 0 : index
    %c3_35 = arith.constant 3 : index
    %47 = memref.load %arg2[%c0_34, %c3_35] : memref<8x12xf32, #tpu.memory_space<smem>>
    %c0_36 = arith.constant 0 : index
    %c4 = arith.constant 4 : index
    %48 = memref.load %arg2[%c0_36, %c4] : memref<8x12xf32, #tpu.memory_space<smem>>
    %c0_37 = arith.constant 0 : index
    %c5 = arith.constant 5 : index
    %49 = memref.load %arg2[%c0_37, %c5] : memref<8x12xf32, #tpu.memory_space<smem>>
    %c0_38 = arith.constant 0 : index
    %c6 = arith.constant 6 : index
    %50 = memref.load %arg2[%c0_38, %c6] : memref<8x12xf32, #tpu.memory_space<smem>>
    %c0_39 = arith.constant 0 : index
    %c7 = arith.constant 7 : index
    %51 = memref.load %arg2[%c0_39, %c7] : memref<8x12xf32, #tpu.memory_space<smem>>
    %c0_40 = arith.constant 0 : index
    %c8 = arith.constant 8 : index
    %52 = memref.load %arg2[%c0_40, %c8] : memref<8x12xf32, #tpu.memory_space<smem>>
    %c0_41 = arith.constant 0 : index
    %c9 = arith.constant 9 : index
    %53 = memref.load %arg2[%c0_41, %c9] : memref<8x12xf32, #tpu.memory_space<smem>>
    %c0_42 = arith.constant 0 : index
    %c10 = arith.constant 10 : index
    %54 = memref.load %arg2[%c0_42, %c10] : memref<8x12xf32, #tpu.memory_space<smem>>
    %c0_43 = arith.constant 0 : index
    %c11 = arith.constant 11 : index
    %55 = memref.load %arg2[%c0_43, %c11] : memref<8x12xf32, #tpu.memory_space<smem>>
    %c0_44 = arith.constant 0 : index
    %c0_45 = arith.constant 0 : index
    %56 = memref.load %arg1[%c0_44, %c0_45] : memref<8x4xf32, #tpu.memory_space<smem>>
    %c0_46 = arith.constant 0 : index
    %c1_47 = arith.constant 1 : index
    %57 = memref.load %arg1[%c0_46, %c1_47] : memref<8x4xf32, #tpu.memory_space<smem>>
    %c0_48 = arith.constant 0 : index
    %c2_49 = arith.constant 2 : index
    %58 = memref.load %arg1[%c0_48, %c2_49] : memref<8x4xf32, #tpu.memory_space<smem>>
    %c0_50 = arith.constant 0 : index
    %c3_51 = arith.constant 3 : index
    %59 = memref.load %arg1[%c0_50, %c3_51] : memref<8x4xf32, #tpu.memory_space<smem>>
    %c0_52 = arith.constant 0 : index
    %60 = memref.load %arg3[%c0_52] : memref<8xf32, #tpu.memory_space<smem>>
    %61 = vector.broadcast %44 : f32 to vector<7x128xf32>
    %62 = arith.mulf %61, %16 : vector<7x128xf32>
    %63 = vector.broadcast %45 : f32 to vector<7x128xf32>
    %64 = arith.mulf %63, %18 : vector<7x128xf32>
    %65 = vector.broadcast %46 : f32 to vector<7x128xf32>
    %66 = arith.mulf %65, %20 : vector<7x128xf32>
    %67 = vector.broadcast %47 : f32 to vector<7x128xf32>
    %68 = arith.mulf %67, %22 : vector<7x128xf32>
    %69 = vector.broadcast %48 : f32 to vector<7x128xf32>
    %70 = arith.mulf %69, %24 : vector<7x128xf32>
    %71 = vector.broadcast %49 : f32 to vector<7x128xf32>
    %72 = arith.mulf %71, %26 : vector<7x128xf32>
    %73 = vector.broadcast %50 : f32 to vector<7x128xf32>
    %74 = arith.mulf %73, %28 : vector<7x128xf32>
    %75 = vector.broadcast %51 : f32 to vector<7x128xf32>
    %76 = arith.mulf %75, %30 : vector<7x128xf32>
    %77 = vector.broadcast %52 : f32 to vector<7x128xf32>
    %78 = arith.mulf %77, %32 : vector<7x128xf32>
    %79 = vector.broadcast %53 : f32 to vector<7x128xf32>
    %80 = arith.mulf %79, %34 : vector<7x128xf32>
    %81 = vector.broadcast %54 : f32 to vector<7x128xf32>
    %82 = arith.mulf %81, %36 : vector<7x128xf32>
    %83 = vector.broadcast %55 : f32 to vector<7x128xf32>
    %84 = arith.mulf %83, %38 : vector<7x128xf32>
    %85 = arith.addf %62, %64 : vector<7x128xf32>
    %86 = arith.addf %66, %68 : vector<7x128xf32>
    %87 = arith.addf %70, %72 : vector<7x128xf32>
    %88 = arith.addf %74, %76 : vector<7x128xf32>
    %89 = arith.addf %78, %80 : vector<7x128xf32>
    %90 = arith.addf %82, %84 : vector<7x128xf32>
    %91 = arith.addf %85, %86 : vector<7x128xf32>
    %92 = arith.addf %87, %88 : vector<7x128xf32>
    %93 = arith.addf %89, %90 : vector<7x128xf32>
    %94 = arith.addf %91, %92 : vector<7x128xf32>
    %95 = arith.addf %94, %93 : vector<7x128xf32>
    %96 = vector.broadcast %44 : f32 to vector<6x128xf32>
    %97 = arith.mulf %96, %17 : vector<6x128xf32>
    %98 = vector.broadcast %45 : f32 to vector<6x128xf32>
    %99 = arith.mulf %98, %19 : vector<6x128xf32>
    %100 = vector.broadcast %46 : f32 to vector<6x128xf32>
    %101 = arith.mulf %100, %21 : vector<6x128xf32>
    %102 = vector.broadcast %47 : f32 to vector<6x128xf32>
    %103 = arith.mulf %102, %23 : vector<6x128xf32>
    %104 = vector.broadcast %48 : f32 to vector<6x128xf32>
    %105 = arith.mulf %104, %25 : vector<6x128xf32>
    %106 = vector.broadcast %49 : f32 to vector<6x128xf32>
    %107 = arith.mulf %106, %27 : vector<6x128xf32>
    %108 = vector.broadcast %50 : f32 to vector<6x128xf32>
    %109 = arith.mulf %108, %29 : vector<6x128xf32>
    %110 = vector.broadcast %51 : f32 to vector<6x128xf32>
    %111 = arith.mulf %110, %31 : vector<6x128xf32>
    %112 = vector.broadcast %52 : f32 to vector<6x128xf32>
    %113 = arith.mulf %112, %33 : vector<6x128xf32>
    %114 = vector.broadcast %53 : f32 to vector<6x128xf32>
    %115 = arith.mulf %114, %35 : vector<6x128xf32>
    %116 = vector.broadcast %54 : f32 to vector<6x128xf32>
    %117 = arith.mulf %116, %37 : vector<6x128xf32>
    %118 = vector.broadcast %55 : f32 to vector<6x128xf32>
    %119 = arith.mulf %118, %39 : vector<6x128xf32>
    %120 = arith.addf %97, %99 : vector<6x128xf32>
    %121 = arith.addf %101, %103 : vector<6x128xf32>
    %122 = arith.addf %105, %107 : vector<6x128xf32>
    %123 = arith.addf %109, %111 : vector<6x128xf32>
    %124 = arith.addf %113, %115 : vector<6x128xf32>
    %125 = arith.addf %117, %119 : vector<6x128xf32>
    %126 = arith.addf %120, %121 : vector<6x128xf32>
    %127 = arith.addf %122, %123 : vector<6x128xf32>
    %128 = arith.addf %124, %125 : vector<6x128xf32>
    %129 = arith.addf %126, %127 : vector<6x128xf32>
    %130 = arith.addf %129, %128 : vector<6x128xf32>
    %131 = vector.extract_strided_slice %95 {offsets = [0, 0], sizes = [6, 128], strides = [1, 1]} : vector<7x128xf32> to vector<6x128xf32>
    %132 = arith.maximumf %131, %130 : vector<6x128xf32>
    %133 = vector.extract_strided_slice %95 {offsets = [1, 0], sizes = [6, 128], strides = [1, 1]} : vector<7x128xf32> to vector<6x128xf32>
    %134 = arith.maximumf %132, %133 : vector<6x128xf32>
    %135 = vector.broadcast %56 : f32 to vector<6x128xf32>
    %136 = arith.mulf %135, %40 : vector<6x128xf32>
    %137 = vector.broadcast %57 : f32 to vector<6x128xf32>
    %138 = arith.mulf %137, %41 : vector<6x128xf32>
    %139 = vector.broadcast %58 : f32 to vector<6x128xf32>
    %140 = arith.mulf %139, %42 : vector<6x128xf32>
    %141 = vector.broadcast %59 : f32 to vector<6x128xf32>
    %142 = arith.mulf %141, %43 : vector<6x128xf32>
    %143 = arith.addf %136, %138 : vector<6x128xf32>
    %144 = arith.addf %140, %142 : vector<6x128xf32>
    %145 = arith.addf %143, %144 : vector<6x128xf32>
    %146 = arith.addf %134, %145 : vector<6x128xf32>
    %147 = vector.broadcast %60 : f32 to vector<6x128xf32>
    %148 = arith.addf %146, %147 : vector<6x128xf32>
    %cst = arith.constant 0.000000e+00 : f32
    %149 = vector.broadcast %cst : f32 to vector<6x128xf32>
    %150 = arith.maximumf %148, %149 : vector<6x128xf32>
    %c0_53 = arith.constant 0 : index
    %c0_54 = arith.constant 0 : index
    %c0_55 = arith.constant 0 : index
    %151 = vector.load %arg5[%c0_53, %c0_54, %c0_55] : memref<8x6x128xf32, #tpu.memory_space<vmem>>, vector<1x6x128xf32>
    %152 = vector.shape_cast %151 : vector<1x6x128xf32> to vector<6x128xf32>
    %153 = vector.shape_cast %150 : vector<6x128xf32> to vector<1x6x128xf32>
    tpu.vector_store %arg5[%c0_53, %c0_54, %c0_55], %153 {strides = array<i32>} : memref<8x6x128xf32, #tpu.memory_space<vmem>>, vector<1x6x128xf32>,
    %c1_56 = arith.constant 1 : index
    %c0_57 = arith.constant 0 : index
    %154 = memref.load %arg2[%c1_56, %c0_57] : memref<8x12xf32, #tpu.memory_space<smem>>
    %c1_58 = arith.constant 1 : index
    %c1_59 = arith.constant 1 : index
    %155 = memref.load %arg2[%c1_58, %c1_59] : memref<8x12xf32, #tpu.memory_space<smem>>
    %c1_60 = arith.constant 1 : index
    %c2_61 = arith.constant 2 : index
    %156 = memref.load %arg2[%c1_60, %c2_61] : memref<8x12xf32, #tpu.memory_space<smem>>
    %c1_62 = arith.constant 1 : index
    %c3_63 = arith.constant 3 : index
    %157 = memref.load %arg2[%c1_62, %c3_63] : memref<8x12xf32, #tpu.memory_space<smem>>
    %c1_64 = arith.constant 1 : index
    %c4_65 = arith.constant 4 : index
    %158 = memref.load %arg2[%c1_64, %c4_65] : memref<8x12xf32, #tpu.memory_space<smem>>
    %c1_66 = arith.constant 1 : index
    %c5_67 = arith.constant 5 : index
    %159 = memref.load %arg2[%c1_66, %c5_67] : memref<8x12xf32, #tpu.memory_space<smem>>
    %c1_68 = arith.constant 1 : index
    %c6_69 = arith.constant 6 : index
    %160 = memref.load %arg2[%c1_68, %c6_69] : memref<8x12xf32, #tpu.memory_space<smem>>
    %c1_70 = arith.constant 1 : index
    %c7_71 = arith.constant 7 : index
    %161 = memref.load %arg2[%c1_70, %c7_71] : memref<8x12xf32, #tpu.memory_space<smem>>
    %c1_72 = arith.constant 1 : index
    %c8_73 = arith.constant 8 : index
    %162 = memref.load %arg2[%c1_72, %c8_73] : memref<8x12xf32, #tpu.memory_space<smem>>
    %c1_74 = arith.constant 1 : index
    %c9_75 = arith.constant 9 : index
    %163 = memref.load %arg2[%c1_74, %c9_75] : memref<8x12xf32, #tpu.memory_space<smem>>
    %c1_76 = arith.constant 1 : index
    %c10_77 = arith.constant 10 : index
    %164 = memref.load %arg2[%c1_76, %c10_77] : memref<8x12xf32, #tpu.memory_space<smem>>
    %c1_78 = arith.constant 1 : index
    %c11_79 = arith.constant 11 : index
    %165 = memref.load %arg2[%c1_78, %c11_79] : memref<8x12xf32, #tpu.memory_space<smem>>
    %c1_80 = arith.constant 1 : index
    %c0_81 = arith.constant 0 : index
    %166 = memref.load %arg1[%c1_80, %c0_81] : memref<8x4xf32, #tpu.memory_space<smem>>
    %c1_82 = arith.constant 1 : index
    %c1_83 = arith.constant 1 : index
    %167 = memref.load %arg1[%c1_82, %c1_83] : memref<8x4xf32, #tpu.memory_space<smem>>
    %c1_84 = arith.constant 1 : index
    %c2_85 = arith.constant 2 : index
    %168 = memref.load %arg1[%c1_84, %c2_85] : memref<8x4xf32, #tpu.memory_space<smem>>
    %c1_86 = arith.constant 1 : index
    %c3_87 = arith.constant 3 : index
    %169 = memref.load %arg1[%c1_86, %c3_87] : memref<8x4xf32, #tpu.memory_space<smem>>
    %c1_88 = arith.constant 1 : index
    %170 = memref.load %arg3[%c1_88] : memref<8xf32, #tpu.memory_space<smem>>
    %171 = vector.broadcast %154 : f32 to vector<7x128xf32>
    %172 = arith.mulf %171, %16 : vector<7x128xf32>
    %173 = vector.broadcast %155 : f32 to vector<7x128xf32>
    %174 = arith.mulf %173, %18 : vector<7x128xf32>
    %175 = vector.broadcast %156 : f32 to vector<7x128xf32>
    %176 = arith.mulf %175, %20 : vector<7x128xf32>
    %177 = vector.broadcast %157 : f32 to vector<7x128xf32>
    %178 = arith.mulf %177, %22 : vector<7x128xf32>
    %179 = vector.broadcast %158 : f32 to vector<7x128xf32>
    %180 = arith.mulf %179, %24 : vector<7x128xf32>
    %181 = vector.broadcast %159 : f32 to vector<7x128xf32>
    %182 = arith.mulf %181, %26 : vector<7x128xf32>
    %183 = vector.broadcast %160 : f32 to vector<7x128xf32>
    %184 = arith.mulf %183, %28 : vector<7x128xf32>
    %185 = vector.broadcast %161 : f32 to vector<7x128xf32>
    %186 = arith.mulf %185, %30 : vector<7x128xf32>
    %187 = vector.broadcast %162 : f32 to vector<7x128xf32>
    %188 = arith.mulf %187, %32 : vector<7x128xf32>
    %189 = vector.broadcast %163 : f32 to vector<7x128xf32>
    %190 = arith.mulf %189, %34 : vector<7x128xf32>
    %191 = vector.broadcast %164 : f32 to vector<7x128xf32>
    %192 = arith.mulf %191, %36 : vector<7x128xf32>
    %193 = vector.broadcast %165 : f32 to vector<7x128xf32>
    %194 = arith.mulf %193, %38 : vector<7x128xf32>
    %195 = arith.addf %172, %174 : vector<7x128xf32>
    %196 = arith.addf %176, %178 : vector<7x128xf32>
    %197 = arith.addf %180, %182 : vector<7x128xf32>
    %198 = arith.addf %184, %186 : vector<7x128xf32>
    %199 = arith.addf %188, %190 : vector<7x128xf32>
    %200 = arith.addf %192, %194 : vector<7x128xf32>
    %201 = arith.addf %195, %196 : vector<7x128xf32>
    %202 = arith.addf %197, %198 : vector<7x128xf32>
    %203 = arith.addf %199, %200 : vector<7x128xf32>
    %204 = arith.addf %201, %202 : vector<7x128xf32>
    %205 = arith.addf %204, %203 : vector<7x128xf32>
    %206 = vector.broadcast %154 : f32 to vector<6x128xf32>
    %207 = arith.mulf %206, %17 : vector<6x128xf32>
    %208 = vector.broadcast %155 : f32 to vector<6x128xf32>
    %209 = arith.mulf %208, %19 : vector<6x128xf32>
    %210 = vector.broadcast %156 : f32 to vector<6x128xf32>
    %211 = arith.mulf %210, %21 : vector<6x128xf32>
    %212 = vector.broadcast %157 : f32 to vector<6x128xf32>
    %213 = arith.mulf %212, %23 : vector<6x128xf32>
    %214 = vector.broadcast %158 : f32 to vector<6x128xf32>
    %215 = arith.mulf %214, %25 : vector<6x128xf32>
    %216 = vector.broadcast %159 : f32 to vector<6x128xf32>
    %217 = arith.mulf %216, %27 : vector<6x128xf32>
    %218 = vector.broadcast %160 : f32 to vector<6x128xf32>
    %219 = arith.mulf %218, %29 : vector<6x128xf32>
    %220 = vector.broadcast %161 : f32 to vector<6x128xf32>
    %221 = arith.mulf %220, %31 : vector<6x128xf32>
    %222 = vector.broadcast %162 : f32 to vector<6x128xf32>
    %223 = arith.mulf %222, %33 : vector<6x128xf32>
    %224 = vector.broadcast %163 : f32 to vector<6x128xf32>
    %225 = arith.mulf %224, %35 : vector<6x128xf32>
    %226 = vector.broadcast %164 : f32 to vector<6x128xf32>
    %227 = arith.mulf %226, %37 : vector<6x128xf32>
    %228 = vector.broadcast %165 : f32 to vector<6x128xf32>
    %229 = arith.mulf %228, %39 : vector<6x128xf32>
    %230 = arith.addf %207, %209 : vector<6x128xf32>
    %231 = arith.addf %211, %213 : vector<6x128xf32>
    %232 = arith.addf %215, %217 : vector<6x128xf32>
    %233 = arith.addf %219, %221 : vector<6x128xf32>
    %234 = arith.addf %223, %225 : vector<6x128xf32>
    %235 = arith.addf %227, %229 : vector<6x128xf32>
    %236 = arith.addf %230, %231 : vector<6x128xf32>
    %237 = arith.addf %232, %233 : vector<6x128xf32>
    %238 = arith.addf %234, %235 : vector<6x128xf32>
    %239 = arith.addf %236, %237 : vector<6x128xf32>
    %240 = arith.addf %239, %238 : vector<6x128xf32>
    %241 = vector.extract_strided_slice %205 {offsets = [0, 0], sizes = [6, 128], strides = [1, 1]} : vector<7x128xf32> to vector<6x128xf32>
    %242 = arith.maximumf %241, %240 : vector<6x128xf32>
    %243 = vector.extract_strided_slice %205 {offsets = [1, 0], sizes = [6, 128], strides = [1, 1]} : vector<7x128xf32> to vector<6x128xf32>
    %244 = arith.maximumf %242, %243 : vector<6x128xf32>
    %245 = vector.broadcast %166 : f32 to vector<6x128xf32>
    %246 = arith.mulf %245, %40 : vector<6x128xf32>
    %247 = vector.broadcast %167 : f32 to vector<6x128xf32>
    %248 = arith.mulf %247, %41 : vector<6x128xf32>
    %249 = vector.broadcast %168 : f32 to vector<6x128xf32>
    %250 = arith.mulf %249, %42 : vector<6x128xf32>
    %251 = vector.broadcast %169 : f32 to vector<6x128xf32>
    %252 = arith.mulf %251, %43 : vector<6x128xf32>
    %253 = arith.addf %246, %248 : vector<6x128xf32>
    %254 = arith.addf %250, %252 : vector<6x128xf32>
    %255 = arith.addf %253, %254 : vector<6x128xf32>
    %256 = arith.addf %244, %255 : vector<6x128xf32>
    %257 = vector.broadcast %170 : f32 to vector<6x128xf32>
    %258 = arith.addf %256, %257 : vector<6x128xf32>
    %cst_89 = arith.constant 0.000000e+00 : f32
    %259 = vector.broadcast %cst_89 : f32 to vector<6x128xf32>
    %260 = arith.maximumf %258, %259 : vector<6x128xf32>
    %c1_90 = arith.constant 1 : index
    %c0_91 = arith.constant 0 : index
    %c0_92 = arith.constant 0 : index
    %261 = vector.load %arg5[%c1_90, %c0_91, %c0_92] : memref<8x6x128xf32, #tpu.memory_space<vmem>>, vector<1x6x128xf32>
    %262 = vector.shape_cast %261 : vector<1x6x128xf32> to vector<6x128xf32>
    %263 = vector.shape_cast %260 : vector<6x128xf32> to vector<1x6x128xf32>
    tpu.vector_store %arg5[%c1_90, %c0_91, %c0_92], %263 {strides = array<i32>} : memref<8x6x128xf32, #tpu.memory_space<vmem>>, vector<1x6x128xf32>,
    %c2_93 = arith.constant 2 : index
    %c0_94 = arith.constant 0 : index
    %264 = memref.load %arg2[%c2_93, %c0_94] : memref<8x12xf32, #tpu.memory_space<smem>>
    %c2_95 = arith.constant 2 : index
    %c1_96 = arith.constant 1 : index
    %265 = memref.load %arg2[%c2_95, %c1_96] : memref<8x12xf32, #tpu.memory_space<smem>>
    %c2_97 = arith.constant 2 : index
    %c2_98 = arith.constant 2 : index
    %266 = memref.load %arg2[%c2_97, %c2_98] : memref<8x12xf32, #tpu.memory_space<smem>>
    %c2_99 = arith.constant 2 : index
    %c3_100 = arith.constant 3 : index
    %267 = memref.load %arg2[%c2_99, %c3_100] : memref<8x12xf32, #tpu.memory_space<smem>>
    %c2_101 = arith.constant 2 : index
    %c4_102 = arith.constant 4 : index
    %268 = memref.load %arg2[%c2_101, %c4_102] : memref<8x12xf32, #tpu.memory_space<smem>>
    %c2_103 = arith.constant 2 : index
    %c5_104 = arith.constant 5 : index
    %269 = memref.load %arg2[%c2_103, %c5_104] : memref<8x12xf32, #tpu.memory_space<smem>>
    %c2_105 = arith.constant 2 : index
    %c6_106 = arith.constant 6 : index
    %270 = memref.load %arg2[%c2_105, %c6_106] : memref<8x12xf32, #tpu.memory_space<smem>>
    %c2_107 = arith.constant 2 : index
    %c7_108 = arith.constant 7 : index
    %271 = memref.load %arg2[%c2_107, %c7_108] : memref<8x12xf32, #tpu.memory_space<smem>>
    %c2_109 = arith.constant 2 : index
    %c8_110 = arith.constant 8 : index
    %272 = memref.load %arg2[%c2_109, %c8_110] : memref<8x12xf32, #tpu.memory_space<smem>>
    %c2_111 = arith.constant 2 : index
    %c9_112 = arith.constant 9 : index
    %273 = memref.load %arg2[%c2_111, %c9_112] : memref<8x12xf32, #tpu.memory_space<smem>>
    %c2_113 = arith.constant 2 : index
    %c10_114 = arith.constant 10 : index
    %274 = memref.load %arg2[%c2_113, %c10_114] : memref<8x12xf32, #tpu.memory_space<smem>>
    %c2_115 = arith.constant 2 : index
    %c11_116 = arith.constant 11 : index
    %275 = memref.load %arg2[%c2_115, %c11_116] : memref<8x12xf32, #tpu.memory_space<smem>>
    %c2_117 = arith.constant 2 : index
    %c0_118 = arith.constant 0 : index
    %276 = memref.load %arg1[%c2_117, %c0_118] : memref<8x4xf32, #tpu.memory_space<smem>>
    %c2_119 = arith.constant 2 : index
    %c1_120 = arith.constant 1 : index
    %277 = memref.load %arg1[%c2_119, %c1_120] : memref<8x4xf32, #tpu.memory_space<smem>>
    %c2_121 = arith.constant 2 : index
    %c2_122 = arith.constant 2 : index
    %278 = memref.load %arg1[%c2_121, %c2_122] : memref<8x4xf32, #tpu.memory_space<smem>>
    %c2_123 = arith.constant 2 : index
    %c3_124 = arith.constant 3 : index
    %279 = memref.load %arg1[%c2_123, %c3_124] : memref<8x4xf32, #tpu.memory_space<smem>>
    %c2_125 = arith.constant 2 : index
    %280 = memref.load %arg3[%c2_125] : memref<8xf32, #tpu.memory_space<smem>>
    %281 = vector.broadcast %264 : f32 to vector<7x128xf32>
    %282 = arith.mulf %281, %16 : vector<7x128xf32>
    %283 = vector.broadcast %265 : f32 to vector<7x128xf32>
    %284 = arith.mulf %283, %18 : vector<7x128xf32>
    %285 = vector.broadcast %266 : f32 to vector<7x128xf32>
    %286 = arith.mulf %285, %20 : vector<7x128xf32>
    %287 = vector.broadcast %267 : f32 to vector<7x128xf32>
    %288 = arith.mulf %287, %22 : vector<7x128xf32>
    %289 = vector.broadcast %268 : f32 to vector<7x128xf32>
    %290 = arith.mulf %289, %24 : vector<7x128xf32>
    %291 = vector.broadcast %269 : f32 to vector<7x128xf32>
    %292 = arith.mulf %291, %26 : vector<7x128xf32>
    %293 = vector.broadcast %270 : f32 to vector<7x128xf32>
    %294 = arith.mulf %293, %28 : vector<7x128xf32>
    %295 = vector.broadcast %271 : f32 to vector<7x128xf32>
    %296 = arith.mulf %295, %30 : vector<7x128xf32>
    %297 = vector.broadcast %272 : f32 to vector<7x128xf32>
    %298 = arith.mulf %297, %32 : vector<7x128xf32>
    %299 = vector.broadcast %273 : f32 to vector<7x128xf32>
    %300 = arith.mulf %299, %34 : vector<7x128xf32>
    %301 = vector.broadcast %274 : f32 to vector<7x128xf32>
    %302 = arith.mulf %301, %36 : vector<7x128xf32>
    %303 = vector.broadcast %275 : f32 to vector<7x128xf32>
    %304 = arith.mulf %303, %38 : vector<7x128xf32>
    %305 = arith.addf %282, %284 : vector<7x128xf32>
    %306 = arith.addf %286, %288 : vector<7x128xf32>
    %307 = arith.addf %290, %292 : vector<7x128xf32>
    %308 = arith.addf %294, %296 : vector<7x128xf32>
    %309 = arith.addf %298, %300 : vector<7x128xf32>
    %310 = arith.addf %302, %304 : vector<7x128xf32>
    %311 = arith.addf %305, %306 : vector<7x128xf32>
    %312 = arith.addf %307, %308 : vector<7x128xf32>
    %313 = arith.addf %309, %310 : vector<7x128xf32>
    %314 = arith.addf %311, %312 : vector<7x128xf32>
    %315 = arith.addf %314, %313 : vector<7x128xf32>
    %316 = vector.broadcast %264 : f32 to vector<6x128xf32>
    %317 = arith.mulf %316, %17 : vector<6x128xf32>
    %318 = vector.broadcast %265 : f32 to vector<6x128xf32>
    %319 = arith.mulf %318, %19 : vector<6x128xf32>
    %320 = vector.broadcast %266 : f32 to vector<6x128xf32>
    %321 = arith.mulf %320, %21 : vector<6x128xf32>
    %322 = vector.broadcast %267 : f32 to vector<6x128xf32>
    %323 = arith.mulf %322, %23 : vector<6x128xf32>
    %324 = vector.broadcast %268 : f32 to vector<6x128xf32>
    %325 = arith.mulf %324, %25 : vector<6x128xf32>
    %326 = vector.broadcast %269 : f32 to vector<6x128xf32>
    %327 = arith.mulf %326, %27 : vector<6x128xf32>
    %328 = vector.broadcast %270 : f32 to vector<6x128xf32>
    %329 = arith.mulf %328, %29 : vector<6x128xf32>
    %330 = vector.broadcast %271 : f32 to vector<6x128xf32>
    %331 = arith.mulf %330, %31 : vector<6x128xf32>
    %332 = vector.broadcast %272 : f32 to vector<6x128xf32>
    %333 = arith.mulf %332, %33 : vector<6x128xf32>
    %334 = vector.broadcast %273 : f32 to vector<6x128xf32>
    %335 = arith.mulf %334, %35 : vector<6x128xf32>
    %336 = vector.broadcast %274 : f32 to vector<6x128xf32>
    %337 = arith.mulf %336, %37 : vector<6x128xf32>
    %338 = vector.broadcast %275 : f32 to vector<6x128xf32>
    %339 = arith.mulf %338, %39 : vector<6x128xf32>
    %340 = arith.addf %317, %319 : vector<6x128xf32>
    %341 = arith.addf %321, %323 : vector<6x128xf32>
    %342 = arith.addf %325, %327 : vector<6x128xf32>
    %343 = arith.addf %329, %331 : vector<6x128xf32>
    %344 = arith.addf %333, %335 : vector<6x128xf32>
    %345 = arith.addf %337, %339 : vector<6x128xf32>
    %346 = arith.addf %340, %341 : vector<6x128xf32>
    %347 = arith.addf %342, %343 : vector<6x128xf32>
    %348 = arith.addf %344, %345 : vector<6x128xf32>
    %349 = arith.addf %346, %347 : vector<6x128xf32>
    %350 = arith.addf %349, %348 : vector<6x128xf32>
    %351 = vector.extract_strided_slice %315 {offsets = [0, 0], sizes = [6, 128], strides = [1, 1]} : vector<7x128xf32> to vector<6x128xf32>
    %352 = arith.maximumf %351, %350 : vector<6x128xf32>
    %353 = vector.extract_strided_slice %315 {offsets = [1, 0], sizes = [6, 128], strides = [1, 1]} : vector<7x128xf32> to vector<6x128xf32>
    %354 = arith.maximumf %352, %353 : vector<6x128xf32>
    %355 = vector.broadcast %276 : f32 to vector<6x128xf32>
    %356 = arith.mulf %355, %40 : vector<6x128xf32>
    %357 = vector.broadcast %277 : f32 to vector<6x128xf32>
    %358 = arith.mulf %357, %41 : vector<6x128xf32>
    %359 = vector.broadcast %278 : f32 to vector<6x128xf32>
    %360 = arith.mulf %359, %42 : vector<6x128xf32>
    %361 = vector.broadcast %279 : f32 to vector<6x128xf32>
    %362 = arith.mulf %361, %43 : vector<6x128xf32>
    %363 = arith.addf %356, %358 : vector<6x128xf32>
    %364 = arith.addf %360, %362 : vector<6x128xf32>
    %365 = arith.addf %363, %364 : vector<6x128xf32>
    %366 = arith.addf %354, %365 : vector<6x128xf32>
    %367 = vector.broadcast %280 : f32 to vector<6x128xf32>
    %368 = arith.addf %366, %367 : vector<6x128xf32>
    %cst_126 = arith.constant 0.000000e+00 : f32
    %369 = vector.broadcast %cst_126 : f32 to vector<6x128xf32>
    %370 = arith.maximumf %368, %369 : vector<6x128xf32>
    %c2_127 = arith.constant 2 : index
    %c0_128 = arith.constant 0 : index
    %c0_129 = arith.constant 0 : index
    %371 = vector.load %arg5[%c2_127, %c0_128, %c0_129] : memref<8x6x128xf32, #tpu.memory_space<vmem>>, vector<1x6x128xf32>
    %372 = vector.shape_cast %371 : vector<1x6x128xf32> to vector<6x128xf32>
    %373 = vector.shape_cast %370 : vector<6x128xf32> to vector<1x6x128xf32>
    tpu.vector_store %arg5[%c2_127, %c0_128, %c0_129], %373 {strides = array<i32>} : memref<8x6x128xf32, #tpu.memory_space<vmem>>, vector<1x6x128xf32>,
    %c3_130 = arith.constant 3 : index
    %c0_131 = arith.constant 0 : index
    %374 = memref.load %arg2[%c3_130, %c0_131] : memref<8x12xf32, #tpu.memory_space<smem>>
    %c3_132 = arith.constant 3 : index
    %c1_133 = arith.constant 1 : index
    %375 = memref.load %arg2[%c3_132, %c1_133] : memref<8x12xf32, #tpu.memory_space<smem>>
    %c3_134 = arith.constant 3 : index
    %c2_135 = arith.constant 2 : index
    %376 = memref.load %arg2[%c3_134, %c2_135] : memref<8x12xf32, #tpu.memory_space<smem>>
    %c3_136 = arith.constant 3 : index
    %c3_137 = arith.constant 3 : index
    %377 = memref.load %arg2[%c3_136, %c3_137] : memref<8x12xf32, #tpu.memory_space<smem>>
    %c3_138 = arith.constant 3 : index
    %c4_139 = arith.constant 4 : index
    %378 = memref.load %arg2[%c3_138, %c4_139] : memref<8x12xf32, #tpu.memory_space<smem>>
    %c3_140 = arith.constant 3 : index
    %c5_141 = arith.constant 5 : index
    %379 = memref.load %arg2[%c3_140, %c5_141] : memref<8x12xf32, #tpu.memory_space<smem>>
    %c3_142 = arith.constant 3 : index
    %c6_143 = arith.constant 6 : index
    %380 = memref.load %arg2[%c3_142, %c6_143] : memref<8x12xf32, #tpu.memory_space<smem>>
    %c3_144 = arith.constant 3 : index
    %c7_145 = arith.constant 7 : index
    %381 = memref.load %arg2[%c3_144, %c7_145] : memref<8x12xf32, #tpu.memory_space<smem>>
    %c3_146 = arith.constant 3 : index
    %c8_147 = arith.constant 8 : index
    %382 = memref.load %arg2[%c3_146, %c8_147] : memref<8x12xf32, #tpu.memory_space<smem>>
    %c3_148 = arith.constant 3 : index
    %c9_149 = arith.constant 9 : index
    %383 = memref.load %arg2[%c3_148, %c9_149] : memref<8x12xf32, #tpu.memory_space<smem>>
    %c3_150 = arith.constant 3 : index
    %c10_151 = arith.constant 10 : index
    %384 = memref.load %arg2[%c3_150, %c10_151] : memref<8x12xf32, #tpu.memory_space<smem>>
    %c3_152 = arith.constant 3 : index
    %c11_153 = arith.constant 11 : index
    %385 = memref.load %arg2[%c3_152, %c11_153] : memref<8x12xf32, #tpu.memory_space<smem>>
    %c3_154 = arith.constant 3 : index
    %c0_155 = arith.constant 0 : index
    %386 = memref.load %arg1[%c3_154, %c0_155] : memref<8x4xf32, #tpu.memory_space<smem>>
    %c3_156 = arith.constant 3 : index
    %c1_157 = arith.constant 1 : index
    %387 = memref.load %arg1[%c3_156, %c1_157] : memref<8x4xf32, #tpu.memory_space<smem>>
    %c3_158 = arith.constant 3 : index
    %c2_159 = arith.constant 2 : index
    %388 = memref.load %arg1[%c3_158, %c2_159] : memref<8x4xf32, #tpu.memory_space<smem>>
    %c3_160 = arith.constant 3 : index
    %c3_161 = arith.constant 3 : index
    %389 = memref.load %arg1[%c3_160, %c3_161] : memref<8x4xf32, #tpu.memory_space<smem>>
    %c3_162 = arith.constant 3 : index
    %390 = memref.load %arg3[%c3_162] : memref<8xf32, #tpu.memory_space<smem>>
    %391 = vector.broadcast %374 : f32 to vector<7x128xf32>
    %392 = arith.mulf %391, %16 : vector<7x128xf32>
    %393 = vector.broadcast %375 : f32 to vector<7x128xf32>
    %394 = arith.mulf %393, %18 : vector<7x128xf32>
    %395 = vector.broadcast %376 : f32 to vector<7x128xf32>
    %396 = arith.mulf %395, %20 : vector<7x128xf32>
    %397 = vector.broadcast %377 : f32 to vector<7x128xf32>
    %398 = arith.mulf %397, %22 : vector<7x128xf32>
    %399 = vector.broadcast %378 : f32 to vector<7x128xf32>
    %400 = arith.mulf %399, %24 : vector<7x128xf32>
    %401 = vector.broadcast %379 : f32 to vector<7x128xf32>
    %402 = arith.mulf %401, %26 : vector<7x128xf32>
    %403 = vector.broadcast %380 : f32 to vector<7x128xf32>
    %404 = arith.mulf %403, %28 : vector<7x128xf32>
    %405 = vector.broadcast %381 : f32 to vector<7x128xf32>
    %406 = arith.mulf %405, %30 : vector<7x128xf32>
    %407 = vector.broadcast %382 : f32 to vector<7x128xf32>
    %408 = arith.mulf %407, %32 : vector<7x128xf32>
    %409 = vector.broadcast %383 : f32 to vector<7x128xf32>
    %410 = arith.mulf %409, %34 : vector<7x128xf32>
    %411 = vector.broadcast %384 : f32 to vector<7x128xf32>
    %412 = arith.mulf %411, %36 : vector<7x128xf32>
    %413 = vector.broadcast %385 : f32 to vector<7x128xf32>
    %414 = arith.mulf %413, %38 : vector<7x128xf32>
    %415 = arith.addf %392, %394 : vector<7x128xf32>
    %416 = arith.addf %396, %398 : vector<7x128xf32>
    %417 = arith.addf %400, %402 : vector<7x128xf32>
    %418 = arith.addf %404, %406 : vector<7x128xf32>
    %419 = arith.addf %408, %410 : vector<7x128xf32>
    %420 = arith.addf %412, %414 : vector<7x128xf32>
    %421 = arith.addf %415, %416 : vector<7x128xf32>
    %422 = arith.addf %417, %418 : vector<7x128xf32>
    %423 = arith.addf %419, %420 : vector<7x128xf32>
    %424 = arith.addf %421, %422 : vector<7x128xf32>
    %425 = arith.addf %424, %423 : vector<7x128xf32>
    %426 = vector.broadcast %374 : f32 to vector<6x128xf32>
    %427 = arith.mulf %426, %17 : vector<6x128xf32>
    %428 = vector.broadcast %375 : f32 to vector<6x128xf32>
    %429 = arith.mulf %428, %19 : vector<6x128xf32>
    %430 = vector.broadcast %376 : f32 to vector<6x128xf32>
    %431 = arith.mulf %430, %21 : vector<6x128xf32>
    %432 = vector.broadcast %377 : f32 to vector<6x128xf32>
    %433 = arith.mulf %432, %23 : vector<6x128xf32>
    %434 = vector.broadcast %378 : f32 to vector<6x128xf32>
    %435 = arith.mulf %434, %25 : vector<6x128xf32>
    %436 = vector.broadcast %379 : f32 to vector<6x128xf32>
    %437 = arith.mulf %436, %27 : vector<6x128xf32>
    %438 = vector.broadcast %380 : f32 to vector<6x128xf32>
    %439 = arith.mulf %438, %29 : vector<6x128xf32>
    %440 = vector.broadcast %381 : f32 to vector<6x128xf32>
    %441 = arith.mulf %440, %31 : vector<6x128xf32>
    %442 = vector.broadcast %382 : f32 to vector<6x128xf32>
    %443 = arith.mulf %442, %33 : vector<6x128xf32>
    %444 = vector.broadcast %383 : f32 to vector<6x128xf32>
    %445 = arith.mulf %444, %35 : vector<6x128xf32>
    %446 = vector.broadcast %384 : f32 to vector<6x128xf32>
    %447 = arith.mulf %446, %37 : vector<6x128xf32>
    %448 = vector.broadcast %385 : f32 to vector<6x128xf32>
    %449 = arith.mulf %448, %39 : vector<6x128xf32>
    %450 = arith.addf %427, %429 : vector<6x128xf32>
    %451 = arith.addf %431, %433 : vector<6x128xf32>
    %452 = arith.addf %435, %437 : vector<6x128xf32>
    %453 = arith.addf %439, %441 : vector<6x128xf32>
    %454 = arith.addf %443, %445 : vector<6x128xf32>
    %455 = arith.addf %447, %449 : vector<6x128xf32>
    %456 = arith.addf %450, %451 : vector<6x128xf32>
    %457 = arith.addf %452, %453 : vector<6x128xf32>
    %458 = arith.addf %454, %455 : vector<6x128xf32>
    %459 = arith.addf %456, %457 : vector<6x128xf32>
    %460 = arith.addf %459, %458 : vector<6x128xf32>
    %461 = vector.extract_strided_slice %425 {offsets = [0, 0], sizes = [6, 128], strides = [1, 1]} : vector<7x128xf32> to vector<6x128xf32>
    %462 = arith.maximumf %461, %460 : vector<6x128xf32>
    %463 = vector.extract_strided_slice %425 {offsets = [1, 0], sizes = [6, 128], strides = [1, 1]} : vector<7x128xf32> to vector<6x128xf32>
    %464 = arith.maximumf %462, %463 : vector<6x128xf32>
    %465 = vector.broadcast %386 : f32 to vector<6x128xf32>
    %466 = arith.mulf %465, %40 : vector<6x128xf32>
    %467 = vector.broadcast %387 : f32 to vector<6x128xf32>
    %468 = arith.mulf %467, %41 : vector<6x128xf32>
    %469 = vector.broadcast %388 : f32 to vector<6x128xf32>
    %470 = arith.mulf %469, %42 : vector<6x128xf32>
    %471 = vector.broadcast %389 : f32 to vector<6x128xf32>
    %472 = arith.mulf %471, %43 : vector<6x128xf32>
    %473 = arith.addf %466, %468 : vector<6x128xf32>
    %474 = arith.addf %470, %472 : vector<6x128xf32>
    %475 = arith.addf %473, %474 : vector<6x128xf32>
    %476 = arith.addf %464, %475 : vector<6x128xf32>
    %477 = vector.broadcast %390 : f32 to vector<6x128xf32>
    %478 = arith.addf %476, %477 : vector<6x128xf32>
    %cst_163 = arith.constant 0.000000e+00 : f32
    %479 = vector.broadcast %cst_163 : f32 to vector<6x128xf32>
    %480 = arith.maximumf %478, %479 : vector<6x128xf32>
    %c3_164 = arith.constant 3 : index
    %c0_165 = arith.constant 0 : index
    %c0_166 = arith.constant 0 : index
    %481 = vector.load %arg5[%c3_164, %c0_165, %c0_166] : memref<8x6x128xf32, #tpu.memory_space<vmem>>, vector<1x6x128xf32>
    %482 = vector.shape_cast %481 : vector<1x6x128xf32> to vector<6x128xf32>
    %483 = vector.shape_cast %480 : vector<6x128xf32> to vector<1x6x128xf32>
    tpu.vector_store %arg5[%c3_164, %c0_165, %c0_166], %483 {strides = array<i32>} : memref<8x6x128xf32, #tpu.memory_space<vmem>>, vector<1x6x128xf32>,
    %c4_167 = arith.constant 4 : index
    %c0_168 = arith.constant 0 : index
    %484 = memref.load %arg2[%c4_167, %c0_168] : memref<8x12xf32, #tpu.memory_space<smem>>
    %c4_169 = arith.constant 4 : index
    %c1_170 = arith.constant 1 : index
    %485 = memref.load %arg2[%c4_169, %c1_170] : memref<8x12xf32, #tpu.memory_space<smem>>
    %c4_171 = arith.constant 4 : index
    %c2_172 = arith.constant 2 : index
    %486 = memref.load %arg2[%c4_171, %c2_172] : memref<8x12xf32, #tpu.memory_space<smem>>
    %c4_173 = arith.constant 4 : index
    %c3_174 = arith.constant 3 : index
    %487 = memref.load %arg2[%c4_173, %c3_174] : memref<8x12xf32, #tpu.memory_space<smem>>
    %c4_175 = arith.constant 4 : index
    %c4_176 = arith.constant 4 : index
    %488 = memref.load %arg2[%c4_175, %c4_176] : memref<8x12xf32, #tpu.memory_space<smem>>
    %c4_177 = arith.constant 4 : index
    %c5_178 = arith.constant 5 : index
    %489 = memref.load %arg2[%c4_177, %c5_178] : memref<8x12xf32, #tpu.memory_space<smem>>
    %c4_179 = arith.constant 4 : index
    %c6_180 = arith.constant 6 : index
    %490 = memref.load %arg2[%c4_179, %c6_180] : memref<8x12xf32, #tpu.memory_space<smem>>
    %c4_181 = arith.constant 4 : index
    %c7_182 = arith.constant 7 : index
    %491 = memref.load %arg2[%c4_181, %c7_182] : memref<8x12xf32, #tpu.memory_space<smem>>
    %c4_183 = arith.constant 4 : index
    %c8_184 = arith.constant 8 : index
    %492 = memref.load %arg2[%c4_183, %c8_184] : memref<8x12xf32, #tpu.memory_space<smem>>
    %c4_185 = arith.constant 4 : index
    %c9_186 = arith.constant 9 : index
    %493 = memref.load %arg2[%c4_185, %c9_186] : memref<8x12xf32, #tpu.memory_space<smem>>
    %c4_187 = arith.constant 4 : index
    %c10_188 = arith.constant 10 : index
    %494 = memref.load %arg2[%c4_187, %c10_188] : memref<8x12xf32, #tpu.memory_space<smem>>
    %c4_189 = arith.constant 4 : index
    %c11_190 = arith.constant 11 : index
    %495 = memref.load %arg2[%c4_189, %c11_190] : memref<8x12xf32, #tpu.memory_space<smem>>
    %c4_191 = arith.constant 4 : index
    %c0_192 = arith.constant 0 : index
    %496 = memref.load %arg1[%c4_191, %c0_192] : memref<8x4xf32, #tpu.memory_space<smem>>
    %c4_193 = arith.constant 4 : index
    %c1_194 = arith.constant 1 : index
    %497 = memref.load %arg1[%c4_193, %c1_194] : memref<8x4xf32, #tpu.memory_space<smem>>
    %c4_195 = arith.constant 4 : index
    %c2_196 = arith.constant 2 : index
    %498 = memref.load %arg1[%c4_195, %c2_196] : memref<8x4xf32, #tpu.memory_space<smem>>
    %c4_197 = arith.constant 4 : index
    %c3_198 = arith.constant 3 : index
    %499 = memref.load %arg1[%c4_197, %c3_198] : memref<8x4xf32, #tpu.memory_space<smem>>
    %c4_199 = arith.constant 4 : index
    %500 = memref.load %arg3[%c4_199] : memref<8xf32, #tpu.memory_space<smem>>
    %501 = vector.broadcast %484 : f32 to vector<7x128xf32>
    %502 = arith.mulf %501, %16 : vector<7x128xf32>
    %503 = vector.broadcast %485 : f32 to vector<7x128xf32>
    %504 = arith.mulf %503, %18 : vector<7x128xf32>
    %505 = vector.broadcast %486 : f32 to vector<7x128xf32>
    %506 = arith.mulf %505, %20 : vector<7x128xf32>
    %507 = vector.broadcast %487 : f32 to vector<7x128xf32>
    %508 = arith.mulf %507, %22 : vector<7x128xf32>
    %509 = vector.broadcast %488 : f32 to vector<7x128xf32>
    %510 = arith.mulf %509, %24 : vector<7x128xf32>
    %511 = vector.broadcast %489 : f32 to vector<7x128xf32>
    %512 = arith.mulf %511, %26 : vector<7x128xf32>
    %513 = vector.broadcast %490 : f32 to vector<7x128xf32>
    %514 = arith.mulf %513, %28 : vector<7x128xf32>
    %515 = vector.broadcast %491 : f32 to vector<7x128xf32>
    %516 = arith.mulf %515, %30 : vector<7x128xf32>
    %517 = vector.broadcast %492 : f32 to vector<7x128xf32>
    %518 = arith.mulf %517, %32 : vector<7x128xf32>
    %519 = vector.broadcast %493 : f32 to vector<7x128xf32>
    %520 = arith.mulf %519, %34 : vector<7x128xf32>
    %521 = vector.broadcast %494 : f32 to vector<7x128xf32>
    %522 = arith.mulf %521, %36 : vector<7x128xf32>
    %523 = vector.broadcast %495 : f32 to vector<7x128xf32>
    %524 = arith.mulf %523, %38 : vector<7x128xf32>
    %525 = arith.addf %502, %504 : vector<7x128xf32>
    %526 = arith.addf %506, %508 : vector<7x128xf32>
    %527 = arith.addf %510, %512 : vector<7x128xf32>
    %528 = arith.addf %514, %516 : vector<7x128xf32>
    %529 = arith.addf %518, %520 : vector<7x128xf32>
    %530 = arith.addf %522, %524 : vector<7x128xf32>
    %531 = arith.addf %525, %526 : vector<7x128xf32>
    %532 = arith.addf %527, %528 : vector<7x128xf32>
    %533 = arith.addf %529, %530 : vector<7x128xf32>
    %534 = arith.addf %531, %532 : vector<7x128xf32>
    %535 = arith.addf %534, %533 : vector<7x128xf32>
    %536 = vector.broadcast %484 : f32 to vector<6x128xf32>
    %537 = arith.mulf %536, %17 : vector<6x128xf32>
    %538 = vector.broadcast %485 : f32 to vector<6x128xf32>
    %539 = arith.mulf %538, %19 : vector<6x128xf32>
    %540 = vector.broadcast %486 : f32 to vector<6x128xf32>
    %541 = arith.mulf %540, %21 : vector<6x128xf32>
    %542 = vector.broadcast %487 : f32 to vector<6x128xf32>
    %543 = arith.mulf %542, %23 : vector<6x128xf32>
    %544 = vector.broadcast %488 : f32 to vector<6x128xf32>
    %545 = arith.mulf %544, %25 : vector<6x128xf32>
    %546 = vector.broadcast %489 : f32 to vector<6x128xf32>
    %547 = arith.mulf %546, %27 : vector<6x128xf32>
    %548 = vector.broadcast %490 : f32 to vector<6x128xf32>
    %549 = arith.mulf %548, %29 : vector<6x128xf32>
    %550 = vector.broadcast %491 : f32 to vector<6x128xf32>
    %551 = arith.mulf %550, %31 : vector<6x128xf32>
    %552 = vector.broadcast %492 : f32 to vector<6x128xf32>
    %553 = arith.mulf %552, %33 : vector<6x128xf32>
    %554 = vector.broadcast %493 : f32 to vector<6x128xf32>
    %555 = arith.mulf %554, %35 : vector<6x128xf32>
    %556 = vector.broadcast %494 : f32 to vector<6x128xf32>
    %557 = arith.mulf %556, %37 : vector<6x128xf32>
    %558 = vector.broadcast %495 : f32 to vector<6x128xf32>
    %559 = arith.mulf %558, %39 : vector<6x128xf32>
    %560 = arith.addf %537, %539 : vector<6x128xf32>
    %561 = arith.addf %541, %543 : vector<6x128xf32>
    %562 = arith.addf %545, %547 : vector<6x128xf32>
    %563 = arith.addf %549, %551 : vector<6x128xf32>
    %564 = arith.addf %553, %555 : vector<6x128xf32>
    %565 = arith.addf %557, %559 : vector<6x128xf32>
    %566 = arith.addf %560, %561 : vector<6x128xf32>
    %567 = arith.addf %562, %563 : vector<6x128xf32>
    %568 = arith.addf %564, %565 : vector<6x128xf32>
    %569 = arith.addf %566, %567 : vector<6x128xf32>
    %570 = arith.addf %569, %568 : vector<6x128xf32>
    %571 = vector.extract_strided_slice %535 {offsets = [0, 0], sizes = [6, 128], strides = [1, 1]} : vector<7x128xf32> to vector<6x128xf32>
    %572 = arith.maximumf %571, %570 : vector<6x128xf32>
    %573 = vector.extract_strided_slice %535 {offsets = [1, 0], sizes = [6, 128], strides = [1, 1]} : vector<7x128xf32> to vector<6x128xf32>
    %574 = arith.maximumf %572, %573 : vector<6x128xf32>
    %575 = vector.broadcast %496 : f32 to vector<6x128xf32>
    %576 = arith.mulf %575, %40 : vector<6x128xf32>
    %577 = vector.broadcast %497 : f32 to vector<6x128xf32>
    %578 = arith.mulf %577, %41 : vector<6x128xf32>
    %579 = vector.broadcast %498 : f32 to vector<6x128xf32>
    %580 = arith.mulf %579, %42 : vector<6x128xf32>
    %581 = vector.broadcast %499 : f32 to vector<6x128xf32>
    %582 = arith.mulf %581, %43 : vector<6x128xf32>
    %583 = arith.addf %576, %578 : vector<6x128xf32>
    %584 = arith.addf %580, %582 : vector<6x128xf32>
    %585 = arith.addf %583, %584 : vector<6x128xf32>
    %586 = arith.addf %574, %585 : vector<6x128xf32>
    %587 = vector.broadcast %500 : f32 to vector<6x128xf32>
    %588 = arith.addf %586, %587 : vector<6x128xf32>
    %cst_200 = arith.constant 0.000000e+00 : f32
    %589 = vector.broadcast %cst_200 : f32 to vector<6x128xf32>
    %590 = arith.maximumf %588, %589 : vector<6x128xf32>
    %c4_201 = arith.constant 4 : index
    %c0_202 = arith.constant 0 : index
    %c0_203 = arith.constant 0 : index
    %591 = vector.load %arg5[%c4_201, %c0_202, %c0_203] : memref<8x6x128xf32, #tpu.memory_space<vmem>>, vector<1x6x128xf32>
    %592 = vector.shape_cast %591 : vector<1x6x128xf32> to vector<6x128xf32>
    %593 = vector.shape_cast %590 : vector<6x128xf32> to vector<1x6x128xf32>
    tpu.vector_store %arg5[%c4_201, %c0_202, %c0_203], %593 {strides = array<i32>} : memref<8x6x128xf32, #tpu.memory_space<vmem>>, vector<1x6x128xf32>,
    %c5_204 = arith.constant 5 : index
    %c0_205 = arith.constant 0 : index
    %594 = memref.load %arg2[%c5_204, %c0_205] : memref<8x12xf32, #tpu.memory_space<smem>>
    %c5_206 = arith.constant 5 : index
    %c1_207 = arith.constant 1 : index
    %595 = memref.load %arg2[%c5_206, %c1_207] : memref<8x12xf32, #tpu.memory_space<smem>>
    %c5_208 = arith.constant 5 : index
    %c2_209 = arith.constant 2 : index
    %596 = memref.load %arg2[%c5_208, %c2_209] : memref<8x12xf32, #tpu.memory_space<smem>>
    %c5_210 = arith.constant 5 : index
    %c3_211 = arith.constant 3 : index
    %597 = memref.load %arg2[%c5_210, %c3_211] : memref<8x12xf32, #tpu.memory_space<smem>>
    %c5_212 = arith.constant 5 : index
    %c4_213 = arith.constant 4 : index
    %598 = memref.load %arg2[%c5_212, %c4_213] : memref<8x12xf32, #tpu.memory_space<smem>>
    %c5_214 = arith.constant 5 : index
    %c5_215 = arith.constant 5 : index
    %599 = memref.load %arg2[%c5_214, %c5_215] : memref<8x12xf32, #tpu.memory_space<smem>>
    %c5_216 = arith.constant 5 : index
    %c6_217 = arith.constant 6 : index
    %600 = memref.load %arg2[%c5_216, %c6_217] : memref<8x12xf32, #tpu.memory_space<smem>>
    %c5_218 = arith.constant 5 : index
    %c7_219 = arith.constant 7 : index
    %601 = memref.load %arg2[%c5_218, %c7_219] : memref<8x12xf32, #tpu.memory_space<smem>>
    %c5_220 = arith.constant 5 : index
    %c8_221 = arith.constant 8 : index
    %602 = memref.load %arg2[%c5_220, %c8_221] : memref<8x12xf32, #tpu.memory_space<smem>>
    %c5_222 = arith.constant 5 : index
    %c9_223 = arith.constant 9 : index
    %603 = memref.load %arg2[%c5_222, %c9_223] : memref<8x12xf32, #tpu.memory_space<smem>>
    %c5_224 = arith.constant 5 : index
    %c10_225 = arith.constant 10 : index
    %604 = memref.load %arg2[%c5_224, %c10_225] : memref<8x12xf32, #tpu.memory_space<smem>>
    %c5_226 = arith.constant 5 : index
    %c11_227 = arith.constant 11 : index
    %605 = memref.load %arg2[%c5_226, %c11_227] : memref<8x12xf32, #tpu.memory_space<smem>>
    %c5_228 = arith.constant 5 : index
    %c0_229 = arith.constant 0 : index
    %606 = memref.load %arg1[%c5_228, %c0_229] : memref<8x4xf32, #tpu.memory_space<smem>>
    %c5_230 = arith.constant 5 : index
    %c1_231 = arith.constant 1 : index
    %607 = memref.load %arg1[%c5_230, %c1_231] : memref<8x4xf32, #tpu.memory_space<smem>>
    %c5_232 = arith.constant 5 : index
    %c2_233 = arith.constant 2 : index
    %608 = memref.load %arg1[%c5_232, %c2_233] : memref<8x4xf32, #tpu.memory_space<smem>>
    %c5_234 = arith.constant 5 : index
    %c3_235 = arith.constant 3 : index
    %609 = memref.load %arg1[%c5_234, %c3_235] : memref<8x4xf32, #tpu.memory_space<smem>>
    %c5_236 = arith.constant 5 : index
    %610 = memref.load %arg3[%c5_236] : memref<8xf32, #tpu.memory_space<smem>>
    %611 = vector.broadcast %594 : f32 to vector<7x128xf32>
    %612 = arith.mulf %611, %16 : vector<7x128xf32>
    %613 = vector.broadcast %595 : f32 to vector<7x128xf32>
    %614 = arith.mulf %613, %18 : vector<7x128xf32>
    %615 = vector.broadcast %596 : f32 to vector<7x128xf32>
    %616 = arith.mulf %615, %20 : vector<7x128xf32>
    %617 = vector.broadcast %597 : f32 to vector<7x128xf32>
    %618 = arith.mulf %617, %22 : vector<7x128xf32>
    %619 = vector.broadcast %598 : f32 to vector<7x128xf32>
    %620 = arith.mulf %619, %24 : vector<7x128xf32>
    %621 = vector.broadcast %599 : f32 to vector<7x128xf32>
    %622 = arith.mulf %621, %26 : vector<7x128xf32>
    %623 = vector.broadcast %600 : f32 to vector<7x128xf32>
    %624 = arith.mulf %623, %28 : vector<7x128xf32>
    %625 = vector.broadcast %601 : f32 to vector<7x128xf32>
    %626 = arith.mulf %625, %30 : vector<7x128xf32>
    %627 = vector.broadcast %602 : f32 to vector<7x128xf32>
    %628 = arith.mulf %627, %32 : vector<7x128xf32>
    %629 = vector.broadcast %603 : f32 to vector<7x128xf32>
    %630 = arith.mulf %629, %34 : vector<7x128xf32>
    %631 = vector.broadcast %604 : f32 to vector<7x128xf32>
    %632 = arith.mulf %631, %36 : vector<7x128xf32>
    %633 = vector.broadcast %605 : f32 to vector<7x128xf32>
    %634 = arith.mulf %633, %38 : vector<7x128xf32>
    %635 = arith.addf %612, %614 : vector<7x128xf32>
    %636 = arith.addf %616, %618 : vector<7x128xf32>
    %637 = arith.addf %620, %622 : vector<7x128xf32>
    %638 = arith.addf %624, %626 : vector<7x128xf32>
    %639 = arith.addf %628, %630 : vector<7x128xf32>
    %640 = arith.addf %632, %634 : vector<7x128xf32>
    %641 = arith.addf %635, %636 : vector<7x128xf32>
    %642 = arith.addf %637, %638 : vector<7x128xf32>
    %643 = arith.addf %639, %640 : vector<7x128xf32>
    %644 = arith.addf %641, %642 : vector<7x128xf32>
    %645 = arith.addf %644, %643 : vector<7x128xf32>
    %646 = vector.broadcast %594 : f32 to vector<6x128xf32>
    %647 = arith.mulf %646, %17 : vector<6x128xf32>
    %648 = vector.broadcast %595 : f32 to vector<6x128xf32>
    %649 = arith.mulf %648, %19 : vector<6x128xf32>
    %650 = vector.broadcast %596 : f32 to vector<6x128xf32>
    %651 = arith.mulf %650, %21 : vector<6x128xf32>
    %652 = vector.broadcast %597 : f32 to vector<6x128xf32>
    %653 = arith.mulf %652, %23 : vector<6x128xf32>
    %654 = vector.broadcast %598 : f32 to vector<6x128xf32>
    %655 = arith.mulf %654, %25 : vector<6x128xf32>
    %656 = vector.broadcast %599 : f32 to vector<6x128xf32>
    %657 = arith.mulf %656, %27 : vector<6x128xf32>
    %658 = vector.broadcast %600 : f32 to vector<6x128xf32>
    %659 = arith.mulf %658, %29 : vector<6x128xf32>
    %660 = vector.broadcast %601 : f32 to vector<6x128xf32>
    %661 = arith.mulf %660, %31 : vector<6x128xf32>
    %662 = vector.broadcast %602 : f32 to vector<6x128xf32>
    %663 = arith.mulf %662, %33 : vector<6x128xf32>
    %664 = vector.broadcast %603 : f32 to vector<6x128xf32>
    %665 = arith.mulf %664, %35 : vector<6x128xf32>
    %666 = vector.broadcast %604 : f32 to vector<6x128xf32>
    %667 = arith.mulf %666, %37 : vector<6x128xf32>
    %668 = vector.broadcast %605 : f32 to vector<6x128xf32>
    %669 = arith.mulf %668, %39 : vector<6x128xf32>
    %670 = arith.addf %647, %649 : vector<6x128xf32>
    %671 = arith.addf %651, %653 : vector<6x128xf32>
    %672 = arith.addf %655, %657 : vector<6x128xf32>
    %673 = arith.addf %659, %661 : vector<6x128xf32>
    %674 = arith.addf %663, %665 : vector<6x128xf32>
    %675 = arith.addf %667, %669 : vector<6x128xf32>
    %676 = arith.addf %670, %671 : vector<6x128xf32>
    %677 = arith.addf %672, %673 : vector<6x128xf32>
    %678 = arith.addf %674, %675 : vector<6x128xf32>
    %679 = arith.addf %676, %677 : vector<6x128xf32>
    %680 = arith.addf %679, %678 : vector<6x128xf32>
    %681 = vector.extract_strided_slice %645 {offsets = [0, 0], sizes = [6, 128], strides = [1, 1]} : vector<7x128xf32> to vector<6x128xf32>
    %682 = arith.maximumf %681, %680 : vector<6x128xf32>
    %683 = vector.extract_strided_slice %645 {offsets = [1, 0], sizes = [6, 128], strides = [1, 1]} : vector<7x128xf32> to vector<6x128xf32>
    %684 = arith.maximumf %682, %683 : vector<6x128xf32>
    %685 = vector.broadcast %606 : f32 to vector<6x128xf32>
    %686 = arith.mulf %685, %40 : vector<6x128xf32>
    %687 = vector.broadcast %607 : f32 to vector<6x128xf32>
    %688 = arith.mulf %687, %41 : vector<6x128xf32>
    %689 = vector.broadcast %608 : f32 to vector<6x128xf32>
    %690 = arith.mulf %689, %42 : vector<6x128xf32>
    %691 = vector.broadcast %609 : f32 to vector<6x128xf32>
    %692 = arith.mulf %691, %43 : vector<6x128xf32>
    %693 = arith.addf %686, %688 : vector<6x128xf32>
    %694 = arith.addf %690, %692 : vector<6x128xf32>
    %695 = arith.addf %693, %694 : vector<6x128xf32>
    %696 = arith.addf %684, %695 : vector<6x128xf32>
    %697 = vector.broadcast %610 : f32 to vector<6x128xf32>
    %698 = arith.addf %696, %697 : vector<6x128xf32>
    %cst_237 = arith.constant 0.000000e+00 : f32
    %699 = vector.broadcast %cst_237 : f32 to vector<6x128xf32>
    %700 = arith.maximumf %698, %699 : vector<6x128xf32>
    %c5_238 = arith.constant 5 : index
    %c0_239 = arith.constant 0 : index
    %c0_240 = arith.constant 0 : index
    %701 = vector.load %arg5[%c5_238, %c0_239, %c0_240] : memref<8x6x128xf32, #tpu.memory_space<vmem>>, vector<1x6x128xf32>
    %702 = vector.shape_cast %701 : vector<1x6x128xf32> to vector<6x128xf32>
    %703 = vector.shape_cast %700 : vector<6x128xf32> to vector<1x6x128xf32>
    tpu.vector_store %arg5[%c5_238, %c0_239, %c0_240], %703 {strides = array<i32>} : memref<8x6x128xf32, #tpu.memory_space<vmem>>, vector<1x6x128xf32>,
    %c6_241 = arith.constant 6 : index
    %c0_242 = arith.constant 0 : index
    %704 = memref.load %arg2[%c6_241, %c0_242] : memref<8x12xf32, #tpu.memory_space<smem>>
    %c6_243 = arith.constant 6 : index
    %c1_244 = arith.constant 1 : index
    %705 = memref.load %arg2[%c6_243, %c1_244] : memref<8x12xf32, #tpu.memory_space<smem>>
    %c6_245 = arith.constant 6 : index
    %c2_246 = arith.constant 2 : index
    %706 = memref.load %arg2[%c6_245, %c2_246] : memref<8x12xf32, #tpu.memory_space<smem>>
    %c6_247 = arith.constant 6 : index
    %c3_248 = arith.constant 3 : index
    %707 = memref.load %arg2[%c6_247, %c3_248] : memref<8x12xf32, #tpu.memory_space<smem>>
    %c6_249 = arith.constant 6 : index
    %c4_250 = arith.constant 4 : index
    %708 = memref.load %arg2[%c6_249, %c4_250] : memref<8x12xf32, #tpu.memory_space<smem>>
    %c6_251 = arith.constant 6 : index
    %c5_252 = arith.constant 5 : index
    %709 = memref.load %arg2[%c6_251, %c5_252] : memref<8x12xf32, #tpu.memory_space<smem>>
    %c6_253 = arith.constant 6 : index
    %c6_254 = arith.constant 6 : index
    %710 = memref.load %arg2[%c6_253, %c6_254] : memref<8x12xf32, #tpu.memory_space<smem>>
    %c6_255 = arith.constant 6 : index
    %c7_256 = arith.constant 7 : index
    %711 = memref.load %arg2[%c6_255, %c7_256] : memref<8x12xf32, #tpu.memory_space<smem>>
    %c6_257 = arith.constant 6 : index
    %c8_258 = arith.constant 8 : index
    %712 = memref.load %arg2[%c6_257, %c8_258] : memref<8x12xf32, #tpu.memory_space<smem>>
    %c6_259 = arith.constant 6 : index
    %c9_260 = arith.constant 9 : index
    %713 = memref.load %arg2[%c6_259, %c9_260] : memref<8x12xf32, #tpu.memory_space<smem>>
    %c6_261 = arith.constant 6 : index
    %c10_262 = arith.constant 10 : index
    %714 = memref.load %arg2[%c6_261, %c10_262] : memref<8x12xf32, #tpu.memory_space<smem>>
    %c6_263 = arith.constant 6 : index
    %c11_264 = arith.constant 11 : index
    %715 = memref.load %arg2[%c6_263, %c11_264] : memref<8x12xf32, #tpu.memory_space<smem>>
    %c6_265 = arith.constant 6 : index
    %c0_266 = arith.constant 0 : index
    %716 = memref.load %arg1[%c6_265, %c0_266] : memref<8x4xf32, #tpu.memory_space<smem>>
    %c6_267 = arith.constant 6 : index
    %c1_268 = arith.constant 1 : index
    %717 = memref.load %arg1[%c6_267, %c1_268] : memref<8x4xf32, #tpu.memory_space<smem>>
    %c6_269 = arith.constant 6 : index
    %c2_270 = arith.constant 2 : index
    %718 = memref.load %arg1[%c6_269, %c2_270] : memref<8x4xf32, #tpu.memory_space<smem>>
    %c6_271 = arith.constant 6 : index
    %c3_272 = arith.constant 3 : index
    %719 = memref.load %arg1[%c6_271, %c3_272] : memref<8x4xf32, #tpu.memory_space<smem>>
    %c6_273 = arith.constant 6 : index
    %720 = memref.load %arg3[%c6_273] : memref<8xf32, #tpu.memory_space<smem>>
    %721 = vector.broadcast %704 : f32 to vector<7x128xf32>
    %722 = arith.mulf %721, %16 : vector<7x128xf32>
    %723 = vector.broadcast %705 : f32 to vector<7x128xf32>
    %724 = arith.mulf %723, %18 : vector<7x128xf32>
    %725 = vector.broadcast %706 : f32 to vector<7x128xf32>
    %726 = arith.mulf %725, %20 : vector<7x128xf32>
    %727 = vector.broadcast %707 : f32 to vector<7x128xf32>
    %728 = arith.mulf %727, %22 : vector<7x128xf32>
    %729 = vector.broadcast %708 : f32 to vector<7x128xf32>
    %730 = arith.mulf %729, %24 : vector<7x128xf32>
    %731 = vector.broadcast %709 : f32 to vector<7x128xf32>
    %732 = arith.mulf %731, %26 : vector<7x128xf32>
    %733 = vector.broadcast %710 : f32 to vector<7x128xf32>
    %734 = arith.mulf %733, %28 : vector<7x128xf32>
    %735 = vector.broadcast %711 : f32 to vector<7x128xf32>
    %736 = arith.mulf %735, %30 : vector<7x128xf32>
    %737 = vector.broadcast %712 : f32 to vector<7x128xf32>
    %738 = arith.mulf %737, %32 : vector<7x128xf32>
    %739 = vector.broadcast %713 : f32 to vector<7x128xf32>
    %740 = arith.mulf %739, %34 : vector<7x128xf32>
    %741 = vector.broadcast %714 : f32 to vector<7x128xf32>
    %742 = arith.mulf %741, %36 : vector<7x128xf32>
    %743 = vector.broadcast %715 : f32 to vector<7x128xf32>
    %744 = arith.mulf %743, %38 : vector<7x128xf32>
    %745 = arith.addf %722, %724 : vector<7x128xf32>
    %746 = arith.addf %726, %728 : vector<7x128xf32>
    %747 = arith.addf %730, %732 : vector<7x128xf32>
    %748 = arith.addf %734, %736 : vector<7x128xf32>
    %749 = arith.addf %738, %740 : vector<7x128xf32>
    %750 = arith.addf %742, %744 : vector<7x128xf32>
    %751 = arith.addf %745, %746 : vector<7x128xf32>
    %752 = arith.addf %747, %748 : vector<7x128xf32>
    %753 = arith.addf %749, %750 : vector<7x128xf32>
    %754 = arith.addf %751, %752 : vector<7x128xf32>
    %755 = arith.addf %754, %753 : vector<7x128xf32>
    %756 = vector.broadcast %704 : f32 to vector<6x128xf32>
    %757 = arith.mulf %756, %17 : vector<6x128xf32>
    %758 = vector.broadcast %705 : f32 to vector<6x128xf32>
    %759 = arith.mulf %758, %19 : vector<6x128xf32>
    %760 = vector.broadcast %706 : f32 to vector<6x128xf32>
    %761 = arith.mulf %760, %21 : vector<6x128xf32>
    %762 = vector.broadcast %707 : f32 to vector<6x128xf32>
    %763 = arith.mulf %762, %23 : vector<6x128xf32>
    %764 = vector.broadcast %708 : f32 to vector<6x128xf32>
    %765 = arith.mulf %764, %25 : vector<6x128xf32>
    %766 = vector.broadcast %709 : f32 to vector<6x128xf32>
    %767 = arith.mulf %766, %27 : vector<6x128xf32>
    %768 = vector.broadcast %710 : f32 to vector<6x128xf32>
    %769 = arith.mulf %768, %29 : vector<6x128xf32>
    %770 = vector.broadcast %711 : f32 to vector<6x128xf32>
    %771 = arith.mulf %770, %31 : vector<6x128xf32>
    %772 = vector.broadcast %712 : f32 to vector<6x128xf32>
    %773 = arith.mulf %772, %33 : vector<6x128xf32>
    %774 = vector.broadcast %713 : f32 to vector<6x128xf32>
    %775 = arith.mulf %774, %35 : vector<6x128xf32>
    %776 = vector.broadcast %714 : f32 to vector<6x128xf32>
    %777 = arith.mulf %776, %37 : vector<6x128xf32>
    %778 = vector.broadcast %715 : f32 to vector<6x128xf32>
    %779 = arith.mulf %778, %39 : vector<6x128xf32>
    %780 = arith.addf %757, %759 : vector<6x128xf32>
    %781 = arith.addf %761, %763 : vector<6x128xf32>
    %782 = arith.addf %765, %767 : vector<6x128xf32>
    %783 = arith.addf %769, %771 : vector<6x128xf32>
    %784 = arith.addf %773, %775 : vector<6x128xf32>
    %785 = arith.addf %777, %779 : vector<6x128xf32>
    %786 = arith.addf %780, %781 : vector<6x128xf32>
    %787 = arith.addf %782, %783 : vector<6x128xf32>
    %788 = arith.addf %784, %785 : vector<6x128xf32>
    %789 = arith.addf %786, %787 : vector<6x128xf32>
    %790 = arith.addf %789, %788 : vector<6x128xf32>
    %791 = vector.extract_strided_slice %755 {offsets = [0, 0], sizes = [6, 128], strides = [1, 1]} : vector<7x128xf32> to vector<6x128xf32>
    %792 = arith.maximumf %791, %790 : vector<6x128xf32>
    %793 = vector.extract_strided_slice %755 {offsets = [1, 0], sizes = [6, 128], strides = [1, 1]} : vector<7x128xf32> to vector<6x128xf32>
    %794 = arith.maximumf %792, %793 : vector<6x128xf32>
    %795 = vector.broadcast %716 : f32 to vector<6x128xf32>
    %796 = arith.mulf %795, %40 : vector<6x128xf32>
    %797 = vector.broadcast %717 : f32 to vector<6x128xf32>
    %798 = arith.mulf %797, %41 : vector<6x128xf32>
    %799 = vector.broadcast %718 : f32 to vector<6x128xf32>
    %800 = arith.mulf %799, %42 : vector<6x128xf32>
    %801 = vector.broadcast %719 : f32 to vector<6x128xf32>
    %802 = arith.mulf %801, %43 : vector<6x128xf32>
    %803 = arith.addf %796, %798 : vector<6x128xf32>
    %804 = arith.addf %800, %802 : vector<6x128xf32>
    %805 = arith.addf %803, %804 : vector<6x128xf32>
    %806 = arith.addf %794, %805 : vector<6x128xf32>
    %807 = vector.broadcast %720 : f32 to vector<6x128xf32>
    %808 = arith.addf %806, %807 : vector<6x128xf32>
    %cst_274 = arith.constant 0.000000e+00 : f32
    %809 = vector.broadcast %cst_274 : f32 to vector<6x128xf32>
    %810 = arith.maximumf %808, %809 : vector<6x128xf32>
    %c6_275 = arith.constant 6 : index
    %c0_276 = arith.constant 0 : index
    %c0_277 = arith.constant 0 : index
    %811 = vector.load %arg5[%c6_275, %c0_276, %c0_277] : memref<8x6x128xf32, #tpu.memory_space<vmem>>, vector<1x6x128xf32>
    %812 = vector.shape_cast %811 : vector<1x6x128xf32> to vector<6x128xf32>
    %813 = vector.shape_cast %810 : vector<6x128xf32> to vector<1x6x128xf32>
    tpu.vector_store %arg5[%c6_275, %c0_276, %c0_277], %813 {strides = array<i32>} : memref<8x6x128xf32, #tpu.memory_space<vmem>>, vector<1x6x128xf32>,
    %c7_278 = arith.constant 7 : index
    %c0_279 = arith.constant 0 : index
    %814 = memref.load %arg2[%c7_278, %c0_279] : memref<8x12xf32, #tpu.memory_space<smem>>
    %c7_280 = arith.constant 7 : index
    %c1_281 = arith.constant 1 : index
    %815 = memref.load %arg2[%c7_280, %c1_281] : memref<8x12xf32, #tpu.memory_space<smem>>
    %c7_282 = arith.constant 7 : index
    %c2_283 = arith.constant 2 : index
    %816 = memref.load %arg2[%c7_282, %c2_283] : memref<8x12xf32, #tpu.memory_space<smem>>
    %c7_284 = arith.constant 7 : index
    %c3_285 = arith.constant 3 : index
    %817 = memref.load %arg2[%c7_284, %c3_285] : memref<8x12xf32, #tpu.memory_space<smem>>
    %c7_286 = arith.constant 7 : index
    %c4_287 = arith.constant 4 : index
    %818 = memref.load %arg2[%c7_286, %c4_287] : memref<8x12xf32, #tpu.memory_space<smem>>
    %c7_288 = arith.constant 7 : index
    %c5_289 = arith.constant 5 : index
    %819 = memref.load %arg2[%c7_288, %c5_289] : memref<8x12xf32, #tpu.memory_space<smem>>
    %c7_290 = arith.constant 7 : index
    %c6_291 = arith.constant 6 : index
    %820 = memref.load %arg2[%c7_290, %c6_291] : memref<8x12xf32, #tpu.memory_space<smem>>
    %c7_292 = arith.constant 7 : index
    %c7_293 = arith.constant 7 : index
    %821 = memref.load %arg2[%c7_292, %c7_293] : memref<8x12xf32, #tpu.memory_space<smem>>
    %c7_294 = arith.constant 7 : index
    %c8_295 = arith.constant 8 : index
    %822 = memref.load %arg2[%c7_294, %c8_295] : memref<8x12xf32, #tpu.memory_space<smem>>
    %c7_296 = arith.constant 7 : index
    %c9_297 = arith.constant 9 : index
    %823 = memref.load %arg2[%c7_296, %c9_297] : memref<8x12xf32, #tpu.memory_space<smem>>
    %c7_298 = arith.constant 7 : index
    %c10_299 = arith.constant 10 : index
    %824 = memref.load %arg2[%c7_298, %c10_299] : memref<8x12xf32, #tpu.memory_space<smem>>
    %c7_300 = arith.constant 7 : index
    %c11_301 = arith.constant 11 : index
    %825 = memref.load %arg2[%c7_300, %c11_301] : memref<8x12xf32, #tpu.memory_space<smem>>
    %c7_302 = arith.constant 7 : index
    %c0_303 = arith.constant 0 : index
    %826 = memref.load %arg1[%c7_302, %c0_303] : memref<8x4xf32, #tpu.memory_space<smem>>
    %c7_304 = arith.constant 7 : index
    %c1_305 = arith.constant 1 : index
    %827 = memref.load %arg1[%c7_304, %c1_305] : memref<8x4xf32, #tpu.memory_space<smem>>
    %c7_306 = arith.constant 7 : index
    %c2_307 = arith.constant 2 : index
    %828 = memref.load %arg1[%c7_306, %c2_307] : memref<8x4xf32, #tpu.memory_space<smem>>
    %c7_308 = arith.constant 7 : index
    %c3_309 = arith.constant 3 : index
    %829 = memref.load %arg1[%c7_308, %c3_309] : memref<8x4xf32, #tpu.memory_space<smem>>
    %c7_310 = arith.constant 7 : index
    %830 = memref.load %arg3[%c7_310] : memref<8xf32, #tpu.memory_space<smem>>
    %831 = vector.broadcast %814 : f32 to vector<7x128xf32>
    %832 = arith.mulf %831, %16 : vector<7x128xf32>
    %833 = vector.broadcast %815 : f32 to vector<7x128xf32>
    %834 = arith.mulf %833, %18 : vector<7x128xf32>
    %835 = vector.broadcast %816 : f32 to vector<7x128xf32>
    %836 = arith.mulf %835, %20 : vector<7x128xf32>
    %837 = vector.broadcast %817 : f32 to vector<7x128xf32>
    %838 = arith.mulf %837, %22 : vector<7x128xf32>
    %839 = vector.broadcast %818 : f32 to vector<7x128xf32>
    %840 = arith.mulf %839, %24 : vector<7x128xf32>
    %841 = vector.broadcast %819 : f32 to vector<7x128xf32>
    %842 = arith.mulf %841, %26 : vector<7x128xf32>
    %843 = vector.broadcast %820 : f32 to vector<7x128xf32>
    %844 = arith.mulf %843, %28 : vector<7x128xf32>
    %845 = vector.broadcast %821 : f32 to vector<7x128xf32>
    %846 = arith.mulf %845, %30 : vector<7x128xf32>
    %847 = vector.broadcast %822 : f32 to vector<7x128xf32>
    %848 = arith.mulf %847, %32 : vector<7x128xf32>
    %849 = vector.broadcast %823 : f32 to vector<7x128xf32>
    %850 = arith.mulf %849, %34 : vector<7x128xf32>
    %851 = vector.broadcast %824 : f32 to vector<7x128xf32>
    %852 = arith.mulf %851, %36 : vector<7x128xf32>
    %853 = vector.broadcast %825 : f32 to vector<7x128xf32>
    %854 = arith.mulf %853, %38 : vector<7x128xf32>
    %855 = arith.addf %832, %834 : vector<7x128xf32>
    %856 = arith.addf %836, %838 : vector<7x128xf32>
    %857 = arith.addf %840, %842 : vector<7x128xf32>
    %858 = arith.addf %844, %846 : vector<7x128xf32>
    %859 = arith.addf %848, %850 : vector<7x128xf32>
    %860 = arith.addf %852, %854 : vector<7x128xf32>
    %861 = arith.addf %855, %856 : vector<7x128xf32>
    %862 = arith.addf %857, %858 : vector<7x128xf32>
    %863 = arith.addf %859, %860 : vector<7x128xf32>
    %864 = arith.addf %861, %862 : vector<7x128xf32>
    %865 = arith.addf %864, %863 : vector<7x128xf32>
    %866 = vector.broadcast %814 : f32 to vector<6x128xf32>
    %867 = arith.mulf %866, %17 : vector<6x128xf32>
    %868 = vector.broadcast %815 : f32 to vector<6x128xf32>
    %869 = arith.mulf %868, %19 : vector<6x128xf32>
    %870 = vector.broadcast %816 : f32 to vector<6x128xf32>
    %871 = arith.mulf %870, %21 : vector<6x128xf32>
    %872 = vector.broadcast %817 : f32 to vector<6x128xf32>
    %873 = arith.mulf %872, %23 : vector<6x128xf32>
    %874 = vector.broadcast %818 : f32 to vector<6x128xf32>
    %875 = arith.mulf %874, %25 : vector<6x128xf32>
    %876 = vector.broadcast %819 : f32 to vector<6x128xf32>
    %877 = arith.mulf %876, %27 : vector<6x128xf32>
    %878 = vector.broadcast %820 : f32 to vector<6x128xf32>
    %879 = arith.mulf %878, %29 : vector<6x128xf32>
    %880 = vector.broadcast %821 : f32 to vector<6x128xf32>
    %881 = arith.mulf %880, %31 : vector<6x128xf32>
    %882 = vector.broadcast %822 : f32 to vector<6x128xf32>
    %883 = arith.mulf %882, %33 : vector<6x128xf32>
    %884 = vector.broadcast %823 : f32 to vector<6x128xf32>
    %885 = arith.mulf %884, %35 : vector<6x128xf32>
    %886 = vector.broadcast %824 : f32 to vector<6x128xf32>
    %887 = arith.mulf %886, %37 : vector<6x128xf32>
    %888 = vector.broadcast %825 : f32 to vector<6x128xf32>
    %889 = arith.mulf %888, %39 : vector<6x128xf32>
    %890 = arith.addf %867, %869 : vector<6x128xf32>
    %891 = arith.addf %871, %873 : vector<6x128xf32>
    %892 = arith.addf %875, %877 : vector<6x128xf32>
    %893 = arith.addf %879, %881 : vector<6x128xf32>
    %894 = arith.addf %883, %885 : vector<6x128xf32>
    %895 = arith.addf %887, %889 : vector<6x128xf32>
    %896 = arith.addf %890, %891 : vector<6x128xf32>
    %897 = arith.addf %892, %893 : vector<6x128xf32>
    %898 = arith.addf %894, %895 : vector<6x128xf32>
    %899 = arith.addf %896, %897 : vector<6x128xf32>
    %900 = arith.addf %899, %898 : vector<6x128xf32>
    %901 = vector.extract_strided_slice %865 {offsets = [0, 0], sizes = [6, 128], strides = [1, 1]} : vector<7x128xf32> to vector<6x128xf32>
    %902 = arith.maximumf %901, %900 : vector<6x128xf32>
    %903 = vector.extract_strided_slice %865 {offsets = [1, 0], sizes = [6, 128], strides = [1, 1]} : vector<7x128xf32> to vector<6x128xf32>
    %904 = arith.maximumf %902, %903 : vector<6x128xf32>
    %905 = vector.broadcast %826 : f32 to vector<6x128xf32>
    %906 = arith.mulf %905, %40 : vector<6x128xf32>
    %907 = vector.broadcast %827 : f32 to vector<6x128xf32>
    %908 = arith.mulf %907, %41 : vector<6x128xf32>
    %909 = vector.broadcast %828 : f32 to vector<6x128xf32>
    %910 = arith.mulf %909, %42 : vector<6x128xf32>
    %911 = vector.broadcast %829 : f32 to vector<6x128xf32>
    %912 = arith.mulf %911, %43 : vector<6x128xf32>
    %913 = arith.addf %906, %908 : vector<6x128xf32>
    %914 = arith.addf %910, %912 : vector<6x128xf32>
    %915 = arith.addf %913, %914 : vector<6x128xf32>
    %916 = arith.addf %904, %915 : vector<6x128xf32>
    %917 = vector.broadcast %830 : f32 to vector<6x128xf32>
    %918 = arith.addf %916, %917 : vector<6x128xf32>
    %cst_311 = arith.constant 0.000000e+00 : f32
    %919 = vector.broadcast %cst_311 : f32 to vector<6x128xf32>
    %920 = arith.maximumf %918, %919 : vector<6x128xf32>
    %c7_312 = arith.constant 7 : index
    %c0_313 = arith.constant 0 : index
    %c0_314 = arith.constant 0 : index
    %921 = vector.load %arg5[%c7_312, %c0_313, %c0_314] : memref<8x6x128xf32, #tpu.memory_space<vmem>>, vector<1x6x128xf32>
    %922 = vector.shape_cast %921 : vector<1x6x128xf32> to vector<6x128xf32>
    %923 = vector.shape_cast %920 : vector<6x128xf32> to vector<1x6x128xf32>
    tpu.vector_store %arg5[%c7_312, %c0_313, %c0_314], %923 {strides = array<i32>} : memref<8x6x128xf32, #tpu.memory_space<vmem>>, vector<1x6x128xf32>,
    return
  }
  func.func @transform_0(%arg0: i32) -> (i32, i32) {
    %c0_i32 = arith.constant 0 : i32
    %c0_i32_0 = arith.constant 0 : i32
    %c0_i32_1 = arith.constant 0 : i32
    return %c0_i32, %c0_i32_0 : i32, i32
  }
  func.func @transform_1(%arg0: i32) -> (i32, i32) {
    %c0_i32 = arith.constant 0 : i32
    %c0_i32_0 = arith.constant 0 : i32
    %c0_i32_1 = arith.constant 0 : i32
    return %c0_i32, %c0_i32_0 : i32, i32
  }
  func.func @transform_2(%arg0: i32) -> i32 {
    %c0_i32 = arith.constant 0 : i32
    %c0_i32_0 = arith.constant 0 : i32
    return %c0_i32 : i32
  }
  func.func @transform_3(%arg0: i32) -> (i32, i32, i32, i32) {
    %c0_i32 = arith.constant 0 : i32
    %c0_i32_0 = arith.constant 0 : i32
    %c0_i32_1 = arith.constant 0 : i32
    %c0_i32_2 = arith.constant 0 : i32
    return %c0_i32, %c0_i32_0, %c0_i32_1, %arg0 : i32, i32, i32, i32
  }
  func.func @transform_4(%arg0: i32) -> (i32, i32, i32) {
    %c0_i32 = arith.constant 0 : i32
    %c0_i32_0 = arith.constant 0 : i32
    %c0_i32_1 = arith.constant 0 : i32
    return %c0_i32, %c0_i32_0, %arg0 : i32, i32, i32
  }
}

</mosaic_0001>

<bundles_post_ra>
// kernel: tpu_custom_call.1
= control target key start
LH: loop header
LB: loop body
LE: loop exit
PB: predicated region body
PF: predicated region fallthrough
CT: control target
= control target key end

     0   :  { %9 = vsyncpa [#allocation4], 0  ;;  %s2207_s0 = inlined_call_operand.vmem [shape: f32[8,4], index: 0, kind: input, shape index: {}]   ;;  %s2208_s1 = inlined_call_operand.vmem [shape: f32[8,12], index: 1, kind: input, shape index: {}]   ;;  %s2209_s2 = inlined_call_operand.vmem [shape: f32[8], index: 2, kind: input, shape index: {}]   ;;  %s2210_s3 = inlined_call_operand.hbm [shape: f32[4,2,8,128], index: 3, kind: input, shape index: {}]   ;;  %s2211_s4 = inlined_call_operand.vmem [shape: f32[8,6,128], index: 4, kind: output, shape index: {}]  }
   0x1   :  { %10 = vsyncpa [#allocation6], 0  ;;  %s28_s17 = sshll.u32 %s2208_s1, 4  ;;  %s29_s17 = int_to_ptr.vmem [resolvable:$true] %s28_s17 }
   0x2   :  { %11 = vsyncpa [#allocation3], 0  ;;  %s18_s20 = sshll.u32 %s2207_s0, 4  ;;  %s1402_s21 = scalar_lea.vmem %s29_s17, 128  ;;  %s19_s20 = int_to_ptr.vmem [resolvable:$true] %s18_s20 }
   0x3   :  { %p1403_p0 = scmp.ne.s32.totalorder %s29_s17, %s1402_s21  ;;  %p1407_p1 = scmp.lt.s32.totalorder %s29_s17, %s29_s17 }
   0x4   :  { %p1408_p2 = scmp.lt.s32.totalorder %s1402_s21, %s1402_s21 }
   0x6   :  { %p1409_p3 = por %p1408_p2, %p1407_p1 }
   0x8   :  { %p1410_p4 = pnand %p1409_p3, %p1403_p0 }
   0xa   :  { %1413 = shalt.err (!%p1410_p4)
}
   0xb   :  { %s1466_s22 = smov [#allocation5]   ;;  %s1414_s23 = scalar_lea.vmem %s19_s20, 128 }
   0xc   :  { %31 = dma.vmem_to_smem %s29_s17, 128, %s1466_s22, [#allocation6]  }
   0xd   :  { %p1415_p5 = scmp.ne.s32.totalorder %s19_s20, %s1414_s23  ;;  %p1419_p6 = scmp.lt.s32.totalorder %s19_s20, %s19_s20 }
   0xe   :  { %p1420_p7 = scmp.lt.s32.totalorder %s1414_s23, %s1414_s23 }
  0x10   :  { %p1421_p8 = por %p1420_p7, %p1419_p6 }
  0x12   :  { %p1422_p9 = pnand %p1421_p8, %p1415_p5 }
  0x14   :  { %1425 = shalt.err (!%p1422_p9)
}
  0x15   :  { %s1467_s1 = smov [#allocation2]   ;;  %s38_s25 = sshll.u32 %s2209_s2, 4  ;;  %s39_s25 = int_to_ptr.vmem [resolvable:$true] %s38_s25 }
  0x16   :  { %21 = dma.vmem_to_smem %s19_s20, 128, %s1467_s1, [#allocation4]  }
  0x17   :  { %s1426_s26 = scalar_lea.vmem %s39_s25, 16  ;;  %p1431_p11 = scmp.lt.s32.totalorder %s39_s25, %s39_s25 }
  0x18   :  { %p1427_p10 = scmp.ne.s32.totalorder %s39_s25, %s1426_s26  ;;  %p1432_p12 = scmp.lt.s32.totalorder %s1426_s26, %s1426_s26 }
  0x1a   :  { %p1433_p13 = por %p1432_p12, %p1431_p11 }
  0x1c   :  { %p1434_p0 = pnand %p1433_p13, %p1427_p10 }
  0x1e   :  { %1437 = shalt.err (!%p1434_p0)
}
  0x1f   :  { %s1468_s27 = smov [#allocation7]   ;;  %s1469_s28 = smov [#allocation8]  }
  0x20   :  { %41 = dma.vmem_to_smem %s39_s25, 16, %s1468_s27, [#allocation6]  }
  0x21   :  { %s47_s29 = sshll.u32 %s1469_s28, 4  ;;  %s1438_s6 = scalar_lea.hbm %s2210_s3, 1024  ;;  %s48_s29 = int_to_ptr.vmem [resolvable:$true] %s47_s29 }
  0x22   :  { %p1439_p1 = scmp.ne.s32.totalorder %s2210_s3, %s1438_s6  ;;  %p1442_p2 = scmp.lt.u32.totalorder %s1438_s6, %s2210_s3 }
  0x24   :  { %p1444_p3 = pnand %p1442_p2, %p1439_p1 }
  0x26   :  { %1447 = shalt.err (!%p1444_p3)
}
  0x27   :  { %s1448_s10 = scalar_lea.vmem %s48_s29, 1024  ;;  %p1453_p5 = scmp.lt.s32.totalorder %s48_s29, %s48_s29 }
  0x28   :  { %p1449_p4 = scmp.ne.s32.totalorder %s48_s29, %s1448_s10  ;;  %p1454_p6 = scmp.lt.s32.totalorder %s1448_s10, %s1448_s10 }
  0x2a   :  { %p1455_p7 = por %p1454_p6, %p1453_p5 }
  0x2c   :  { %p1456_p8 = pnand %p1455_p7, %p1449_p4 }
  0x2e   :  { %1459 = shalt.err (!%p1456_p8)
}
  0x2f   :  { %s1470_s11 = smov 128   ;;  %s1471_s12 = smov 8  }
  0x30   :  { %53 = dma.hbm_to_vmem [thread:$0]  %s2210_s3, 1024, %s48_s29, [#allocation3], %s1470_s11, %s1470_s11, %s1471_s12  }
  0x31   :  { %1460 = dma.done.wait [#allocation4], 128  }
  0x32   :  { %1461 = vsyncadd [#allocation4], 4294967168 }
  0x33   :  { %1462 = dma.done.wait [#allocation6], 144  }
  0x34   :  { %1463 = vsyncadd [#allocation6], 4294967152 }
  0x35   :  { %1464 = dma.done.wait [#allocation3], 1024  }
  0x36   :  { %1465 = vsyncadd [#allocation3], 4294966272 }
  0x37   :  { %66 = sfence }
  0x38   :  { %s82_s15 = sld [smem:[#allocation5]]  ;;  %s1248_s16 = sld [smem:[#allocation5 + $0x1]]  ;;  %v1530_v0 = vld [vmem:[#allocation8] sm:$0xff]  ;;  %v1536_v1 = vld [vmem:[#allocation8 + $0x10] sm:$0xff]  ;;  %v1538_v2 = vld [vmem:[#allocation8 + $0x8] sm:$0xff] }
  0x39   :  { %s1518_s17 = sld [smem:[#allocation5 + $0x2]]  ;;  %s1520_s18 = sld [smem:[#allocation5 + $0x3]]  ;;  %v1554_v11 = vld [vmem:[#allocation8 + $0x20] sm:$0xff]  ;;  %v1556_v12 = vld [vmem:[#allocation8 + $0x18] sm:$0xff]  ;;  %v1562_v17 = vld [vmem:[#allocation8 + $0x30] sm:$0xff] }
  0x3a   :  { %s1522_s19 = sld [smem:[#allocation5 + $0x4]]  ;;  %s1524_s20 = sld [smem:[#allocation5 + $0x5]]  ;;  %v1564_v18 = vld [vmem:[#allocation8 + $0x28] sm:$0xff]  ;;  %v1566_v19 = vld [vmem:[#allocation8 + $0x38] sm:$0xff] }
  0x3b   :  { %s1526_s3 = sld [smem:[#allocation5 + $0x6]]  ;;  %s1528_s21 = sld [smem:[#allocation5 + $0x7]] }
  0x3c   :  { %s1532_s22 = sld [smem:[#allocation5 + $0x8]]  ;;  %s1534_s23 = sld [smem:[#allocation5 + $0x9]] }
  0x3d   :  { %s1540_s1 = sld [smem:[#allocation5 + $0xa]]  ;;  %s1542_s0 = sld [smem:[#allocation5 + $0xb]] }
  0x3e   :  { %v99_v3 = vstv %s82_s15  ;;  %v101_v5 = vstv %s1248_s16  ;;  %s1582_s24 = sld [smem:[#allocation2]]  ;;  %s1584_s25 = sld [smem:[#allocation2 + $0x1]] }
  0x3f   :  { %v100_v4 = vmul.f32 %v99_v3, %v1530_v0  ;;  %v1546_v6 = vmul.f32 %v99_v3, %v1538_v2  ;;  %v102_v7 = vmul.f32 %v101_v5, %v1538_v2  ;;  %v103_v8 = vstv %s1518_s17  ;;  %s1589_s26 = sld [smem:[#allocation2 + $0x2]]  ;;  %s1591_s27 = sld [smem:[#allocation2 + $0x3]] }
  0x40   :  { %v105_v9 = vstv %s1520_s18  ;;  %v1552_v10 = vmul.f32 %v101_v5, %v1530_v0  ;;  %v104_v13 = vmul.f32 %v103_v8, %v1530_v0  ;;  %v107_v15 = vstv %s1522_s19  ;;  %s1597_s28 = sld [smem:[#allocation7]]  ;;  %s1605_s30 = sld [smem:[#allocation5 + $0x81]] }
  0x41   :  { %v106_v14 = vmul.f32 %v105_v9, %v1536_v1  ;;  %v109_v16 = vstv %s1524_s20  ;;  %v108_v20 = vmul.f32 %v107_v15, %v1556_v12  ;;  %v111_v22 = vstv %s1526_s3  ;;  %s1602_s29 = sld [smem:[#allocation5 + $0x80]]  ;;  %s1607_s5 = sld [smem:[#allocation5 + $0x82]] }
  0x42   :  { %v110_v21 = vmul.f32 %v109_v16, %v1536_v1  ;;  %v113_v23 = vstv %s1528_s21  ;;  %v112_v24 = vmul.f32 %v111_v22, %v1554_v11  ;;  %v115_v26 = vstv %s1532_s22  ;;  %s1610_s6 = sld [smem:[#allocation5 + $0x83]]  ;;  %s1612_s7 = sld [smem:[#allocation5 + $0x84]] }
  0x43   :  { %v114_v25 = vmul.f32 %v113_v23, %v1564_v18  ;;  %v117_v27 = vstv %s1534_s23  ;;  %v116_v28 = vmul.f32 %v115_v26, %v1554_v11  ;;  %v119_v30 = vstv %s1540_s1  ;;  %s1616_s8 = sld [smem:[#allocation5 + $0x85]]  ;;  %s1620_s2 = sld [smem:[#allocation5 + $0x86]] }
  0x44   :  { %v118_v29 = vmul.f32 %v117_v27, %v1562_v17  ;;  %v121_v31 = vstv %s1542_s0  ;;  %v120_v32 = vmul.f32 %v119_v30, %v1566_v19  ;;  %v123_v34 = vadd.f32 %v102_v7, %v100_v4  ;;  %s1622_s9 = sld [smem:[#allocation5 + $0x87]]  ;;  %s1626_s10 = sld [smem:[#allocation5 + $0x88]] }
  0x45   :  { %v122_v33 = vmul.f32 %v121_v31, %v1562_v17  ;;  %v125_v35 = vrot.slane %v106_v14, 7  ;;  %v129_v36 = vrot.slane %v110_v21, 1  ;;  %v132_v37 = vadd.f32 %v114_v25, %v112_v24  ;;  %s1628_s11 = sld [smem:[#allocation5 + $0x89]]  ;;  %s1632_s12 = sld [smem:[#allocation5 + $0x8a]] }
  0x46   :  { %v134_v38 = vrot.slane %v118_v29, 7  ;;  %v157_v39 = vmul.f32 %v103_v8, %v1538_v2  ;;  %v158_v42 = vmul.f32 %v105_v9, %v1556_v12  ;;  %v159_v43 = vmul.f32 %v107_v15, %v1536_v1  ;;  %s1634_s13 = sld [smem:[#allocation5 + $0x8b]]  ;;  %s1662_s14 = sld [smem:[#allocation2 + $0x80]] }
  0x47   :  { %v127_v40 = vadd.f32 %v125_v35, %v104_v13  ;;  %v138_v41 = vrot.slane %v122_v33, 1  ;;  %v131_v44 = vadd.f32 %v129_v36, %v108_v20  ;;  %v160_v46 = vmul.f32 %v109_v16, %v1556_v12  ;;  %s1664_s15 = sld [smem:[#allocation2 + $0x81]]  ;;  %s1669_s16 = sld [smem:[#allocation2 + $0x82]] }
  0x48   :  { %v136_v45 = vadd.f32 %v134_v38, %v116_v28  ;;  %v161_v47 = vmul.f32 %v111_v22, %v1564_v18  ;;  %v162_v50 = vmul.f32 %v113_v23, %v1554_v11  ;;  %v163_v51 = vmul.f32 %v115_v26, %v1564_v18  ;;  %s1671_s17 = sld [smem:[#allocation2 + $0x83]]  ;;  %s1677_s18 = sld [smem:[#allocation7 + $0x1]] }
  0x49   :  { %v140_v48 = vadd.f32 %v138_v41, %v120_v32  ;;  %v142_v49 = vrot.slane %v127_v40, 1  ;;  %v145_v52 = vadd.f32 %v132_v37, %v131_v44  ;;  %v164_v53 = vmul.f32 %v117_v27, %v1566_v19  ;;  %s1683_s19 = sld [smem:[#allocation5 + $0x100]]  ;;  %s1685_s20 = sld [smem:[#allocation5 + $0x101]] }
  0x4a   :  { %v165_v54 = vmul.f32 %v119_v30, %v1562_v17  ;;  %v166_v55 = vmul.f32 %v121_v31, %v1566_v19  ;;  %v168_v58 = vrot.slane %v1552_v10, 1  ;;  %v172_v59 = vrot.slane %v158_v42, 7  ;;  %s1687_s3 = sld [smem:[#allocation5 + $0x102]]  ;;  %s1692_s23 = sld [smem:[#allocation5 + $0x103]] }
  0x4b   :  { %v144_v56 = vadd.f32 %v142_v49, %v123_v34  ;;  %v147_v57 = vrot.slane %v140_v48, 7  ;;  %v175_v60 = vadd.f32 %v160_v46, %v159_v43  ;;  %v177_v61 = vrot.slane %v162_v50, 1  ;;  %s1694_s1 = sld [smem:[#allocation5 + $0x104]]  ;;  %s1698_s0 = sld [smem:[#allocation5 + $0x105]] }
  0x4c   :  { %v181_v62 = vrot.slane %v164_v53, 7  ;;  %v184_v63 = vadd.f32 %v166_v55, %v165_v54  ;;  %v170_v5 = vadd.f32 %v168_v58, %v1546_v6  ;;  %v174_v7 = vadd.f32 %v172_v59, %v157_v39  ;;  %s1826_s21 = sld [smem:[#allocation2 + $0x180]]  ;;  %s1828_s22 = sld [smem:[#allocation2 + $0x181]] }
  0x4d   :  { %v149_v3 = vadd.f32 %v147_v57, %v136_v45  ;;  %v150_v4 = vadd.f32 %v145_v52, %v144_v56  ;;  %v179_v8 = vadd.f32 %v177_v61, %v161_v47  ;;  %v207_v10 = vstv %s1582_s24  ;;  %s1702_s24 = sld [smem:[#allocation5 + $0x106]] }
  0x4e   :  { %v183_v9 = vadd.f32 %v181_v62, %v163_v51  ;;  %v209_v13 = vstv %s1584_s25  ;;  %v186_v15 = vrot.slane %v174_v7, 1  ;;  %v208_v16 = vmul.f32 %v207_v10, %v1530_v0  ;;  %s1704_s25 = sld [smem:[#allocation5 + $0x107]] }
  0x4f   :  { %v152_v14 = vrot.slane %v149_v3, 1  ;;  %v210_v20 = vmul.f32 %v209_v13, %v1536_v1  ;;  %v190_v6 = vrot.slane %v179_v8, 7  ;;  %v211_v22 = vstv %s1589_s26  ;;  %s1708_s26 = sld [smem:[#allocation5 + $0x108]] }
  0x50   :  { %v193_v21 = vadd.f32 %v184_v63, %v183_v9  ;;  %v213_v23 = vstv %s1591_s27  ;;  %v188_v25 = vadd.f32 %v186_v15, %v170_v5  ;;  %v212_v26 = vmul.f32 %v211_v22, %v1554_v11  ;;  %s1710_s27 = sld [smem:[#allocation5 + $0x109]] }
  0x51   :  { %v154_v24 = vadd.f32 %v152_v14, %v150_v4  ;;  %v214_v27 = vmul.f32 %v213_v23, %v1562_v17  ;;  %v192_v28 = vadd.f32 %v190_v6, %v175_v60  ;;  %v215_v30 = vadd.f32 %v210_v20, %v208_v16 }
  0x52   :  { %v199_v29 = vrot.slane %v193_v21, 1  ;;  %v222_v31 = vstv %s1597_s28  ;;  %v243_v34 = vstv %s1602_s29  ;;  %v245_v35 = vstv %s1605_s30  ;;  %s1714_s28 = sld [smem:[#allocation5 + $0x10a]]  ;;  %s1716_s29 = sld [smem:[#allocation5 + $0x10b]] }
  0x53   :  { %v204_v32 = vrot.slane %v154_v24, 1  ;;  %v216_v33 = vadd.f32 %v214_v27, %v212_v26  ;;  %v195_v36 = vrot.slane %v192_v28, 1  ;;  %v244_v37 = vmul.f32 %v243_v34, %v1530_v0  ;;  %s1744_s30 = sld [smem:[#allocation2 + $0x100]] }
  0x54   :  { %v246_v38 = vmul.f32 %v245_v35, %v1538_v2  ;;  %v247_v39 = vstv %s1607_s5  ;;  %v249_v42 = vstv %s1610_s6  ;;  %v251_v43 = vstv %s1612_s7  ;;  %s1746_s5 = sld [smem:[#allocation2 + $0x101]]  ;;  %s1751_s6 = sld [smem:[#allocation2 + $0x102]] }
  0x55   :  { %v217_v40 = vadd.f32 %v216_v33, %v215_v30  ;;  %v248_v41 = vmul.f32 %v247_v39, %v1530_v0  ;;  %v197_v44 = vadd.f32 %v195_v36, %v188_v25  ;;  %v250_v45 = vmul.f32 %v249_v42, %v1536_v1  ;;  %s1753_s7 = sld [smem:[#allocation2 + $0x103]] }
  0x56   :  { %v252_v46 = vmul.f32 %v251_v43, %v1556_v12  ;;  %v253_v47 = vstv %s1616_s8  ;;  %v255_v50 = vstv %s1620_s2  ;;  %v257_v51 = vstv %s1622_s9  ;;  %s1759_s8 = sld [smem:[#allocation7 + $0x2]]  ;;  %s1765_s2 = sld [smem:[#allocation5 + $0x180]] }
  0x57   :  { %v219_v48 = vrot.slane %v217_v40, 2  ;;  %v254_v49 = vmul.f32 %v253_v47, %v1536_v1  ;;  %v201_v52 = vadd.f32 %v199_v29, %v197_v44  ;;  %v256_v53 = vmul.f32 %v255_v50, %v1554_v11  ;;  %s1767_s9 = sld [smem:[#allocation5 + $0x181]] }
  0x58   :  { %v258_v54 = vmul.f32 %v257_v51, %v1564_v18  ;;  %v259_v55 = vstv %s1626_s10  ;;  %v261_v57 = vstv %s1628_s11  ;;  %v263_v58 = vstv %s1632_s12  ;;  %s1769_s10 = sld [smem:[#allocation5 + $0x182]]  ;;  %s1908_s11 = sld [smem:[#allocation2 + $0x200]] }
  0x59   :  { %v260_v56 = vmul.f32 %v259_v55, %v1554_v11  ;;  %v265_v59 = vstv %s1634_s13  ;;  %v202_v60 = vmax.f32 %v154_v24, %v201_v52  ;;  %v262_v61 = vmul.f32 %v261_v57, %v1562_v17  ;;  %s1774_s13 = sld [smem:[#allocation5 + $0x183]]  ;;  %s1910_s12 = sld [smem:[#allocation2 + $0x201]] }
  0x5a   :  { %v264_v62 = vmul.f32 %v263_v58, %v1566_v19  ;;  %v266_v63 = vmul.f32 %v265_v59, %v1562_v17  ;;  %v267_v3 = vadd.f32 %v246_v38, %v244_v37  ;;  %v269_v4 = vrot.slane %v250_v45, 7 }
  0x5b   :  { %v273_v5 = vrot.slane %v254_v49, 1  ;;  %v276_v7 = vadd.f32 %v258_v54, %v256_v53  ;;  %v206_v8 = vmax.f32 %v202_v60, %v204_v32  ;;  %v278_v9 = vrot.slane %v262_v61, 7 }
  0x5c   :  { %v282_v10 = vrot.slane %v266_v63, 1  ;;  %v299_v13 = vmul.f32 %v243_v34, %v1538_v2  ;;  %v271_v14 = vadd.f32 %v269_v4, %v248_v41  ;;  %v300_v16 = vmul.f32 %v245_v35, %v1530_v0 }
  0x5d   :  { %v275_v15 = vadd.f32 %v273_v5, %v252_v46  ;;  %v301_v20 = vmul.f32 %v247_v39, %v1538_v2  ;;  %v221_v6 = vadd.f32 %v219_v48, %v206_v8  ;;  %v280_v21 = vadd.f32 %v278_v9, %v260_v56 }
  0x5e   :  { %v284_v22 = vadd.f32 %v282_v10, %v264_v62  ;;  %v302_v23 = vmul.f32 %v249_v42, %v1556_v12  ;;  %v286_v24 = vrot.slane %v271_v14, 1  ;;  %v303_v26 = vmul.f32 %v251_v43, %v1536_v1 }
  0x5f   :  { %v289_v25 = vadd.f32 %v276_v7, %v275_v15  ;;  %v304_v27 = vmul.f32 %v253_v47, %v1556_v12  ;;  %v223_v28 = vadd.f32 %v222_v31, %v221_v6  ;;  %v305_v30 = vmul.f32 %v255_v50, %v1564_v18 }
  0x60   :  { %v291_v29 = vrot.slane %v284_v22, 7  ;;  %v306_v32 = vmul.f32 %v257_v51, %v1554_v11  ;;  %v288_v33 = vadd.f32 %v286_v24, %v267_v3  ;;  %v307_v34 = vmul.f32 %v259_v55, %v1564_v18 }
  0x61   :  { %v308_v35 = vmul.f32 %v261_v57, %v1566_v19  ;;  %v309_v36 = vmul.f32 %v263_v58, %v1562_v17  ;;  %v224_v37 = vmax.f32 %v223_v28, 0.0  ;;  %v310_v39 = vmul.f32 %v265_v59, %v1566_v19 }
  0x62   :  { %v293_v38 = vadd.f32 %v291_v29, %v280_v21  ;;  %v312_v40 = vrot.slane %v300_v16, 1  ;;  %v294_v31 = vadd.f32 %v289_v25, %v288_v33  ;;  %v316_v41 = vrot.slane %v302_v23, 7 }
  0x63   :  { %v319_v42 = vadd.f32 %v304_v27, %v303_v26  ;;  %v321_v43 = vrot.slane %v306_v32, 1  ;;  %225 = vst [vmem:[%s2211_s4] sm:$0x3f] %v224_v37  ;;  %v325_v46 = vrot.slane %v308_v35, 7  ;;  %v328_v47 = vadd.f32 %v310_v39, %v309_v36 }
  0x64   :  { %v296_v44 = vrot.slane %v293_v38, 1  ;;  %v314_v45 = vadd.f32 %v312_v40, %v299_v13  ;;  %v318_v48 = vadd.f32 %v316_v41, %v301_v20  ;;  %v351_v50 = vstv %s1662_s14  ;;  %s1776_s14 = sld [smem:[#allocation5 + $0x184]] }
  0x65   :  { %v323_v49 = vadd.f32 %v321_v43, %v305_v30  ;;  %v353_v51 = vstv %s1664_s15  ;;  %v327_v53 = vadd.f32 %v325_v46, %v307_v34  ;;  %v352_v54 = vmul.f32 %v351_v50, %v1530_v0  ;;  %s1780_s15 = sld [smem:[#allocation5 + $0x185]] }
  0x66   :  { %v298_v52 = vadd.f32 %v296_v44, %v294_v31  ;;  %v354_v55 = vmul.f32 %v353_v51, %v1536_v1  ;;  %v330_v56 = vrot.slane %v318_v48, 1  ;;  %v355_v58 = vstv %s1669_s16  ;;  %s1784_s16 = sld [smem:[#allocation5 + $0x186]] }
  0x67   :  { %v334_v57 = vrot.slane %v323_v49, 7  ;;  %v357_v59 = vstv %s1671_s17  ;;  %v337_v60 = vadd.f32 %v328_v47, %v327_v53  ;;  %v356_v62 = vmul.f32 %v355_v58, %v1554_v11  ;;  %s1786_s17 = sld [smem:[#allocation5 + $0x187]] }
  0x68   :  { %v348_v61 = vrot.slane %v298_v52, 1  ;;  %v358_v63 = vmul.f32 %v357_v59, %v1562_v17  ;;  %v332_v3 = vadd.f32 %v330_v56, %v314_v45  ;;  %v359_v5 = vadd.f32 %v354_v55, %v352_v54 }
  0x69   :  { %v336_v4 = vadd.f32 %v334_v57, %v319_v42  ;;  %v366_v7 = vstv %s1677_s18  ;;  %v343_v8 = vrot.slane %v337_v60, 1  ;;  %v388_v10 = vstv %s1683_s19  ;;  %s1790_s18 = sld [smem:[#allocation5 + $0x188]]  ;;  %s1792_s19 = sld [smem:[#allocation5 + $0x189]] }
  0x6a   :  { %v360_v9 = vadd.f32 %v358_v63, %v356_v62  ;;  %v390_v13 = vstv %s1685_s20  ;;  %v389_v15 = vmul.f32 %v388_v10, %v1530_v0  ;;  %v392_v20 = vstv %s1687_s3  ;;  %s1796_s20 = sld [smem:[#allocation5 + $0x18a]]  ;;  %s1798_s3 = sld [smem:[#allocation5 + $0x18b]] }
  0x6b   :  { %v339_v14 = vrot.slane %v336_v4, 1  ;;  %v391_v16 = vmul.f32 %v390_v13, %v1538_v2  ;;  %v393_v21 = vmul.f32 %v392_v20, %v1530_v0  ;;  %v394_v22 = vstv %s1692_s23  ;;  %s1833_s23 = sld [smem:[#allocation2 + $0x182]] }
  0x6c   :  { %v361_v6 = vadd.f32 %v360_v9, %v359_v5  ;;  %v396_v23 = vstv %s1694_s1  ;;  %v395_v25 = vmul.f32 %v394_v22, %v1536_v1  ;;  %v398_v27 = vstv %s1698_s0  ;;  %s1835_s1 = sld [smem:[#allocation2 + $0x183]] }
  0x6d   :  { %v341_v24 = vadd.f32 %v339_v14, %v332_v3  ;;  %v397_v26 = vmul.f32 %v396_v23, %v1556_v12  ;;  %v399_v29 = vmul.f32 %v398_v27, %v1536_v1  ;;  %v400_v30 = vstv %s1702_s24  ;;  %s1841_s0 = sld [smem:[#allocation7 + $0x3]]  ;;  %s1847_s24 = sld [smem:[#allocation5 + $0x200]] }
  0x6e   :  { %v363_v28 = vrot.slane %v361_v6, 2  ;;  %v402_v32 = vstv %s1704_s25  ;;  %v401_v34 = vmul.f32 %v400_v30, %v1554_v11  ;;  %v404_v36 = vstv %s1708_s26  ;;  %s1849_s25 = sld [smem:[#allocation5 + $0x201]]  ;;  %s1851_s26 = sld [smem:[#allocation5 + $0x202]] }
  0x6f   :  { %v345_v33 = vadd.f32 %v343_v8, %v341_v24  ;;  %v403_v35 = vmul.f32 %v402_v32, %v1564_v18  ;;  %v405_v37 = vmul.f32 %v404_v36, %v1554_v11  ;;  %v406_v38 = vstv %s1710_s27  ;;  %s2010_s27 = sld [smem:[#allocation2 + $0x280]] }
  0x70   :  { %v408_v39 = vstv %s1714_s28  ;;  %v410_v40 = vstv %s1716_s29  ;;  %v407_v41 = vmul.f32 %v406_v38, %v1562_v17  ;;  %v412_v44 = vadd.f32 %v391_v16, %v389_v15  ;;  %s1856_s29 = sld [smem:[#allocation5 + $0x203]]  ;;  %s2012_s28 = sld [smem:[#allocation2 + $0x281]] }
  0x71   :  { %v346_v31 = vmax.f32 %v298_v52, %v345_v33  ;;  %v409_v42 = vmul.f32 %v408_v39, %v1566_v19  ;;  %v411_v43 = vmul.f32 %v410_v40, %v1562_v17  ;;  %v414_v45 = vrot.slane %v395_v25, 7 }
  0x72   :  { %v418_v46 = vrot.slane %v399_v29, 1  ;;  %v421_v47 = vadd.f32 %v403_v35, %v401_v34  ;;  %v423_v49 = vrot.slane %v407_v41, 7  ;;  %v444_v51 = vmul.f32 %v388_v10, %v1538_v2 }
  0x73   :  { %v350_v48 = vmax.f32 %v346_v31, %v348_v61  ;;  %v427_v50 = vrot.slane %v411_v43, 1  ;;  %v416_v52 = vadd.f32 %v414_v45, %v393_v21  ;;  %v445_v54 = vmul.f32 %v390_v13, %v1530_v0 }
  0x74   :  { %v420_v53 = vadd.f32 %v418_v46, %v397_v26  ;;  %v446_v55 = vmul.f32 %v392_v20, %v1538_v2  ;;  %v425_v57 = vadd.f32 %v423_v49, %v405_v37  ;;  %v447_v59 = vmul.f32 %v394_v22, %v1556_v12 }
  0x75   :  { %v365_v56 = vadd.f32 %v363_v28, %v350_v48  ;;  %v429_v58 = vadd.f32 %v427_v50, %v409_v42  ;;  %v431_v60 = vrot.slane %v416_v52, 1  ;;  %v448_v62 = vmul.f32 %v396_v23, %v1536_v1 }
  0x76   :  { %v434_v61 = vadd.f32 %v421_v47, %v420_v53  ;;  %v449_v63 = vmul.f32 %v398_v27, %v1556_v12  ;;  %v450_v5 = vmul.f32 %v400_v30, %v1564_v18  ;;  %v451_v8 = vmul.f32 %v402_v32, %v1554_v11 }
  0x77   :  { %v367_v3 = vadd.f32 %v366_v7, %v365_v56  ;;  %v436_v4 = vrot.slane %v429_v58, 7  ;;  %v433_v9 = vadd.f32 %v431_v60, %v412_v44  ;;  %v452_v10 = vmul.f32 %v404_v36, %v1564_v18 }
  0x78   :  { %v453_v13 = vmul.f32 %v406_v38, %v1566_v19  ;;  %v454_v14 = vmul.f32 %v408_v39, %v1562_v17  ;;  %v455_v20 = vmul.f32 %v410_v40, %v1566_v19  ;;  %v457_v6 = vrot.slane %v445_v54, 1 }
  0x79   :  { %v368_v15 = vmax.f32 %v367_v3, 0.0  ;;  %v438_v16 = vadd.f32 %v436_v4, %v425_v57  ;;  %v439_v7 = vadd.f32 %v434_v61, %v433_v9  ;;  %v461_v21 = vrot.slane %v447_v59, 7 }
  0x7a   :  { %v464_v22 = vadd.f32 %v449_v63, %v448_v62  ;;  %v466_v23 = vrot.slane %v451_v8, 1  ;;  %v459_v25 = vadd.f32 %v457_v6, %v444_v51  ;;  %v470_v26 = vrot.slane %v453_v13, 7 }
  0x7b   :  { %1279 = vst [vmem:[%s2211_s4 + $0x8] sm:$0x3f] %v368_v15  ;;  %v441_v24 = vrot.slane %v438_v16, 1  ;;  %v473_v27 = vadd.f32 %v455_v20, %v454_v14  ;;  %v463_v28 = vadd.f32 %v461_v21, %v446_v55  ;;  %v496_v30 = vstv %s1744_s30  ;;  %s1858_s30 = sld [smem:[#allocation5 + $0x204]] }
  0x7c   :  { %v468_v29 = vadd.f32 %v466_v23, %v450_v5  ;;  %v498_v32 = vstv %s1746_s5  ;;  %v472_v34 = vadd.f32 %v470_v26, %v452_v10  ;;  %v497_v35 = vmul.f32 %v496_v30, %v1530_v0  ;;  %s1862_s5 = sld [smem:[#allocation5 + $0x205]] }
  0x7d   :  { %v443_v33 = vadd.f32 %v441_v24, %v439_v7  ;;  %v499_v36 = vmul.f32 %v498_v32, %v1536_v1  ;;  %v475_v37 = vrot.slane %v463_v28, 1  ;;  %v500_v39 = vstv %s1751_s6  ;;  %s1866_s6 = sld [smem:[#allocation5 + $0x206]] }
  0x7e   :  { %v479_v38 = vrot.slane %v468_v29, 7  ;;  %v502_v40 = vstv %s1753_s7  ;;  %v482_v31 = vadd.f32 %v473_v27, %v472_v34  ;;  %v501_v42 = vmul.f32 %v500_v39, %v1554_v11  ;;  %s1868_s7 = sld [smem:[#allocation5 + $0x207]] }
  0x7f   :  { %v493_v41 = vrot.slane %v443_v33, 1  ;;  %v503_v43 = vmul.f32 %v502_v40, %v1562_v17  ;;  %v477_v44 = vadd.f32 %v475_v37, %v459_v25  ;;  %v504_v46 = vadd.f32 %v499_v36, %v497_v35 }
  0x80   :  { %v481_v45 = vadd.f32 %v479_v38, %v464_v22  ;;  %v511_v47 = vstv %s1759_s8  ;;  %v488_v48 = vrot.slane %v482_v31, 1  ;;  %v533_v50 = vstv %s1765_s2  ;;  %s1872_s8 = sld [smem:[#allocation5 + $0x208]]  ;;  %s1874_s2 = sld [smem:[#allocation5 + $0x209]] }
  0x81   :  { %v505_v49 = vadd.f32 %v503_v43, %v501_v42  ;;  %v535_v51 = vstv %s1767_s9  ;;  %v534_v53 = vmul.f32 %v533_v50, %v1530_v0  ;;  %v537_v55 = vstv %s1769_s10  ;;  %s1878_s9 = sld [smem:[#allocation5 + $0x20a]]  ;;  %s1880_s10 = sld [smem:[#allocation5 + $0x20b]] }
  0x82   :  { %v484_v52 = vrot.slane %v481_v45, 1  ;;  %v536_v54 = vmul.f32 %v535_v51, %v1538_v2  ;;  %v538_v57 = vmul.f32 %v537_v55, %v1530_v0  ;;  %v539_v58 = vstv %s1774_s13  ;;  %s1915_s13 = sld [smem:[#allocation2 + $0x202]] }
  0x83   :  { %v506_v56 = vadd.f32 %v505_v49, %v504_v46  ;;  %v541_v59 = vstv %s1776_s14  ;;  %v540_v61 = vmul.f32 %v539_v58, %v1536_v1  ;;  %v543_v63 = vstv %s1780_s15  ;;  %s1917_s14 = sld [smem:[#allocation2 + $0x203]]  ;;  %s1923_s15 = sld [smem:[#allocation7 + $0x4]] }
  0x84   :  { %v486_v60 = vadd.f32 %v484_v52, %v477_v44  ;;  %v542_v62 = vmul.f32 %v541_v59, %v1556_v12  ;;  %v544_v4 = vmul.f32 %v543_v63, %v1536_v1  ;;  %v545_v5 = vstv %s1784_s16  ;;  %s1929_s16 = sld [smem:[#allocation5 + $0x280]] }
  0x85   :  { %v508_v3 = vrot.slane %v506_v56, 2  ;;  %v547_v8 = vstv %s1786_s17  ;;  %v546_v10 = vmul.f32 %v545_v5, %v1554_v11  ;;  %v549_v14 = vstv %s1790_s18  ;;  %s1931_s17 = sld [smem:[#allocation5 + $0x281]]  ;;  %s1933_s18 = sld [smem:[#allocation5 + $0x282]] }
  0x86   :  { %v490_v9 = vadd.f32 %v488_v48, %v486_v60  ;;  %v548_v13 = vmul.f32 %v547_v8, %v1564_v18  ;;  %v550_v15 = vmul.f32 %v549_v14, %v1554_v11  ;;  %v551_v16 = vstv %s1792_s19  ;;  %s2092_s19 = sld [smem:[#allocation2 + $0x300]] }
  0x87   :  { %v553_v20 = vstv %s1796_s20  ;;  %v555_v6 = vstv %s1798_s3  ;;  %v552_v21 = vmul.f32 %v551_v16, %v1562_v17  ;;  %v557_v24 = vadd.f32 %v536_v54, %v534_v53  ;;  %s1938_s3 = sld [smem:[#allocation5 + $0x283]]  ;;  %s2094_s20 = sld [smem:[#allocation2 + $0x301]] }
  0x88   :  { %v491_v7 = vmax.f32 %v443_v33, %v490_v9  ;;  %v554_v22 = vmul.f32 %v553_v20, %v1566_v19  ;;  %v556_v23 = vmul.f32 %v555_v6, %v1562_v17  ;;  %v559_v25 = vrot.slane %v540_v61, 7 }
  0x89   :  { %v563_v26 = vrot.slane %v544_v4, 1  ;;  %v566_v27 = vadd.f32 %v548_v13, %v546_v10  ;;  %v568_v29 = vrot.slane %v552_v21, 7  ;;  %v589_v32 = vmul.f32 %v533_v50, %v1538_v2 }
  0x8a   :  { %v495_v28 = vmax.f32 %v491_v7, %v493_v41  ;;  %v572_v30 = vrot.slane %v556_v23, 1  ;;  %v561_v33 = vadd.f32 %v559_v25, %v538_v57  ;;  %v590_v35 = vmul.f32 %v535_v51, %v1530_v0 }
  0x8b   :  { %v565_v34 = vadd.f32 %v563_v26, %v542_v62  ;;  %v591_v36 = vmul.f32 %v537_v55, %v1538_v2  ;;  %v570_v38 = vadd.f32 %v568_v29, %v550_v15  ;;  %v592_v40 = vmul.f32 %v539_v58, %v1556_v12 }
  0x8c   :  { %v510_v37 = vadd.f32 %v508_v3, %v495_v28  ;;  %v574_v39 = vadd.f32 %v572_v30, %v554_v22  ;;  %v576_v31 = vrot.slane %v561_v33, 1  ;;  %v593_v42 = vmul.f32 %v541_v59, %v1536_v1 }
  0x8d   :  { %v579_v41 = vadd.f32 %v566_v27, %v565_v34  ;;  %v594_v43 = vmul.f32 %v543_v63, %v1556_v12  ;;  %v595_v46 = vmul.f32 %v545_v5, %v1564_v18  ;;  %v596_v48 = vmul.f32 %v547_v8, %v1554_v11 }
  0x8e   :  { %v512_v44 = vadd.f32 %v511_v47, %v510_v37  ;;  %v581_v45 = vrot.slane %v574_v39, 7  ;;  %v578_v49 = vadd.f32 %v576_v31, %v557_v24  ;;  %v597_v50 = vmul.f32 %v549_v14, %v1564_v18 }
  0x8f   :  { %v598_v51 = vmul.f32 %v551_v16, %v1566_v19  ;;  %v599_v52 = vmul.f32 %v553_v20, %v1562_v17  ;;  %v600_v55 = vmul.f32 %v555_v6, %v1566_v19  ;;  %v602_v56 = vrot.slane %v590_v35, 1 }
  0x90   :  { %v513_v53 = vmax.f32 %v512_v44, 0.0  ;;  %v583_v54 = vadd.f32 %v581_v45, %v570_v38  ;;  %v584_v47 = vadd.f32 %v579_v41, %v578_v49  ;;  %v606_v57 = vrot.slane %v592_v40, 7 }
  0x91   :  { %v609_v58 = vadd.f32 %v594_v43, %v593_v42  ;;  %v611_v59 = vrot.slane %v596_v48, 1  ;;  %v604_v61 = vadd.f32 %v602_v56, %v589_v32  ;;  %v615_v62 = vrot.slane %v598_v51, 7 }
  0x92   :  { %1297 = vst [vmem:[%s2211_s4 + $0x10] sm:$0x3f] %v513_v53  ;;  %v586_v60 = vrot.slane %v583_v54, 1  ;;  %v618_v63 = vadd.f32 %v600_v55, %v599_v52  ;;  %v608_v3 = vadd.f32 %v606_v57, %v591_v36  ;;  %v641_v5 = vstv %s1826_s21  ;;  %s1940_s21 = sld [smem:[#allocation5 + $0x284]] }
  0x93   :  { %v613_v4 = vadd.f32 %v611_v59, %v595_v46  ;;  %v643_v8 = vstv %s1828_s22  ;;  %v617_v10 = vadd.f32 %v615_v62, %v597_v50  ;;  %v642_v13 = vmul.f32 %v641_v5, %v1530_v0  ;;  %s1944_s22 = sld [smem:[#allocation5 + $0x285]] }
  0x94   :  { %v588_v9 = vadd.f32 %v586_v60, %v584_v47  ;;  %v644_v14 = vmul.f32 %v643_v8, %v1536_v1  ;;  %v620_v15 = vrot.slane %v608_v3, 1  ;;  %v645_v20 = vstv %s1833_s23  ;;  %s1954_s23 = sld [smem:[#allocation5 + $0x286]] }
  0x95   :  { %v624_v16 = vrot.slane %v613_v4, 7  ;;  %v647_v6 = vstv %s1835_s1  ;;  %v627_v7 = vadd.f32 %v618_v63, %v617_v10  ;;  %v646_v22 = vmul.f32 %v645_v20, %v1554_v11  ;;  %s1956_s1 = sld [smem:[#allocation5 + $0x287]] }
  0x96   :  { %v638_v21 = vrot.slane %v588_v9, 1  ;;  %v648_v23 = vmul.f32 %v647_v6, %v1562_v17  ;;  %v622_v24 = vadd.f32 %v620_v15, %v604_v61  ;;  %v649_v26 = vadd.f32 %v644_v14, %v642_v13 }
  0x97   :  { %v626_v25 = vadd.f32 %v624_v16, %v609_v58  ;;  %v656_v27 = vstv %s1841_s0  ;;  %v633_v28 = vrot.slane %v627_v7, 1  ;;  %v678_v30 = vstv %s1847_s24  ;;  %s1960_s0 = sld [smem:[#allocation5 + $0x288]]  ;;  %s1962_s24 = sld [smem:[#allocation5 + $0x289]] }
  0x98   :  { %v650_v29 = vadd.f32 %v648_v23, %v646_v22  ;;  %v680_v32 = vstv %s1849_s25  ;;  %v679_v34 = vmul.f32 %v678_v30, %v1530_v0  ;;  %v682_v36 = vstv %s1851_s26  ;;  %s1971_s25 = sld [smem:[#allocation5 + $0x28a]]  ;;  %s1973_s26 = sld [smem:[#allocation5 + $0x28b]] }
  0x99   :  { %v629_v33 = vrot.slane %v626_v25, 1  ;;  %v681_v35 = vmul.f32 %v680_v32, %v1538_v2  ;;  %v683_v38 = vmul.f32 %v682_v36, %v1530_v0  ;;  %v684_v39 = vstv %s1856_s29  ;;  %s2017_s29 = sld [smem:[#allocation2 + $0x282]] }
  0x9a   :  { %v651_v37 = vadd.f32 %v650_v29, %v649_v26  ;;  %v686_v40 = vstv %s1858_s30  ;;  %v685_v41 = vmul.f32 %v684_v39, %v1536_v1  ;;  %v688_v43 = vstv %s1862_s5  ;;  %s2019_s30 = sld [smem:[#allocation2 + $0x283]]  ;;  %s2025_s5 = sld [smem:[#allocation7 + $0x5]] }
  0x9b   :  { %v631_v31 = vadd.f32 %v629_v33, %v622_v24  ;;  %v687_v42 = vmul.f32 %v686_v40, %v1556_v12  ;;  %v689_v45 = vmul.f32 %v688_v43, %v1536_v1  ;;  %v690_v46 = vstv %s1866_s6  ;;  %s2031_s6 = sld [smem:[#allocation5 + $0x300]] }
  0x9c   :  { %v653_v44 = vrot.slane %v651_v37, 2  ;;  %v692_v48 = vstv %s1868_s7  ;;  %v691_v50 = vmul.f32 %v690_v46, %v1554_v11  ;;  %v694_v52 = vstv %s1872_s8  ;;  %s2033_s7 = sld [smem:[#allocation5 + $0x301]]  ;;  %s2035_s8 = sld [smem:[#allocation5 + $0x302]] }
  0x9d   :  { %v635_v49 = vadd.f32 %v633_v28, %v631_v31  ;;  %v693_v51 = vmul.f32 %v692_v48, %v1564_v18  ;;  %v695_v53 = vmul.f32 %v694_v52, %v1554_v11  ;;  %v696_v54 = vstv %s1874_s2  ;;  %s2174_s2 = sld [smem:[#allocation2 + $0x380]] }
  0x9e   :  { %v698_v55 = vstv %s1878_s9  ;;  %v700_v56 = vstv %s1880_s10  ;;  %v697_v57 = vmul.f32 %v696_v54, %v1562_v17  ;;  %v702_v60 = vadd.f32 %v681_v35, %v679_v34  ;;  %s2040_s10 = sld [smem:[#allocation5 + $0x303]]  ;;  %s2176_s9 = sld [smem:[#allocation2 + $0x381]] }
  0x9f   :  { %v636_v47 = vmax.f32 %v588_v9, %v635_v49  ;;  %v699_v58 = vmul.f32 %v698_v55, %v1566_v19  ;;  %v701_v59 = vmul.f32 %v700_v56, %v1562_v17  ;;  %v704_v61 = vrot.slane %v685_v41, 7 }
  0xa0   :  { %v708_v62 = vrot.slane %v689_v45, 1  ;;  %v711_v63 = vadd.f32 %v693_v51, %v691_v50  ;;  %v713_v4 = vrot.slane %v697_v57, 7  ;;  %v734_v8 = vmul.f32 %v678_v30, %v1538_v2 }
  0xa1   :  { %v640_v3 = vmax.f32 %v636_v47, %v638_v21  ;;  %v717_v5 = vrot.slane %v701_v59, 1  ;;  %v706_v9 = vadd.f32 %v704_v61, %v683_v38  ;;  %v735_v13 = vmul.f32 %v680_v32, %v1530_v0 }
  0xa2   :  { %v710_v10 = vadd.f32 %v708_v62, %v687_v42  ;;  %v736_v14 = vmul.f32 %v682_v36, %v1538_v2  ;;  %v715_v16 = vadd.f32 %v713_v4, %v695_v53  ;;  %v737_v6 = vmul.f32 %v684_v39, %v1556_v12  ;;  %v1948_v42 = vld [vmem:[#allocation8] sm:$0xff] }
  0xa3   :  { %v655_v15 = vadd.f32 %v653_v44, %v640_v3  ;;  %v719_v20 = vadd.f32 %v717_v5, %v699_v58  ;;  %v721_v7 = vrot.slane %v706_v9, 1  ;;  %v738_v22 = vmul.f32 %v686_v40, %v1536_v1  ;;  %v1951_v44 = vld [vmem:[#allocation8 + $0x10] sm:$0xff]  ;;  %v1965_v53 = vld [vmem:[#allocation8 + $0x20] sm:$0xff]  ;;  %v1979_v5 = vld [vmem:[#allocation8 + $0x8] sm:$0xff] }
  0xa4   :  { %v724_v21 = vadd.f32 %v711_v63, %v710_v10  ;;  %v739_v23 = vmul.f32 %v688_v43, %v1556_v12  ;;  %v740_v0 = vmul.f32 %v690_v46, %v1564_v18  ;;  %v741_v2 = vmul.f32 %v692_v48, %v1554_v11 }
  0xa5   :  { %v657_v24 = vadd.f32 %v656_v27, %v655_v15  ;;  %v726_v25 = vrot.slane %v719_v20, 7  ;;  %v723_v26 = vadd.f32 %v721_v7, %v702_v60  ;;  %v742_v28 = vmul.f32 %v694_v52, %v1564_v18 }
  0xa6   :  { %v743_v29 = vmul.f32 %v696_v54, %v1566_v19  ;;  %v744_v30 = vmul.f32 %v698_v55, %v1562_v17  ;;  %v745_v1 = vmul.f32 %v700_v56, %v1566_v19  ;;  %v747_v12 = vrot.slane %v735_v13, 1  ;;  %v1968_v55 = vld [vmem:[#allocation8 + $0x30] sm:$0xff] }
  0xa7   :  { %v658_v32 = vmax.f32 %v657_v24, 0.0  ;;  %v728_v33 = vadd.f32 %v726_v25, %v715_v16  ;;  %v729_v11 = vadd.f32 %v724_v21, %v723_v26  ;;  %v751_v27 = vrot.slane %v737_v6, 7  ;;  %v1987_v6 = vld [vmem:[#allocation8 + $0x18] sm:$0xff]  ;;  %v1995_v26 = vld [vmem:[#allocation8 + $0x28] sm:$0xff] }
  0xa8   :  { %v754_v34 = vadd.f32 %v739_v23, %v738_v22  ;;  %v756_v35 = vrot.slane %v741_v2, 1  ;;  %v749_v18 = vadd.f32 %v747_v12, %v734_v8  ;;  %v760_v19 = vrot.slane %v743_v29, 7 }
  0xa9   :  { %1315 = vst [vmem:[%s2211_s4 + $0x18] sm:$0x3f] %v658_v32  ;;  %v731_v17 = vrot.slane %v728_v33, 1  ;;  %v763_v36 = vadd.f32 %v745_v1, %v744_v30  ;;  %v753_v37 = vadd.f32 %v751_v27, %v736_v14  ;;  %v786_v39 = vstv %s1908_s11  ;;  %v2005_v27 = vld [vmem:[#allocation8 + $0x38] sm:$0xff]  ;;  %s2042_s11 = sld [smem:[#allocation5 + $0x304]] }
  0xaa   :  { %v758_v38 = vadd.f32 %v756_v35, %v740_v0  ;;  %v788_v40 = vstv %s1910_s12  ;;  %v762_v41 = vadd.f32 %v760_v19, %v742_v28  ;;  %v787_v43 = vmul.f32 %v1948_v42, %v786_v39  ;;  %s2046_s12 = sld [smem:[#allocation5 + $0x305]] }
  0xab   :  { %v1946_v31 = vadd.f32 %v731_v17, %v729_v11  ;;  %v789_v45 = vmul.f32 %v1951_v44, %v788_v40  ;;  %v765_v46 = vrot.slane %v753_v37, 1  ;;  %v790_v49 = vstv %s1915_s13  ;;  %s2050_s13 = sld [smem:[#allocation5 + $0x306]] }
  0xac   :  { %v769_v48 = vrot.slane %v758_v38, 7  ;;  %v792_v50 = vstv %s1917_s14  ;;  %v772_v51 = vadd.f32 %v763_v36, %v762_v41  ;;  %v791_v54 = vmul.f32 %v1965_v53, %v790_v49  ;;  %s2052_s14 = sld [smem:[#allocation5 + $0x307]] }
  0xad   :  { %v783_v52 = vrot.slane %v1946_v31, 1  ;;  %v793_v56 = vmul.f32 %v1968_v55, %v792_v50  ;;  %v767_v47 = vadd.f32 %v765_v46, %v749_v18  ;;  %v794_v58 = vadd.f32 %v789_v45, %v787_v43 }
  0xae   :  { %v771_v57 = vadd.f32 %v769_v48, %v754_v34  ;;  %v801_v59 = vstv %s1923_s15  ;;  %v778_v60 = vrot.slane %v772_v51, 1  ;;  %v823_v62 = vstv %s1929_s16  ;;  %s2056_s15 = sld [smem:[#allocation5 + $0x308]]  ;;  %s2058_s16 = sld [smem:[#allocation5 + $0x309]] }
  0xaf   :  { %v795_v61 = vadd.f32 %v793_v56, %v791_v54  ;;  %v825_v63 = vstv %s1931_s17  ;;  %v824_v4 = vmul.f32 %v1948_v42, %v823_v62  ;;  %v827_v9 = vstv %s1933_s18  ;;  %s2062_s17 = sld [smem:[#allocation5 + $0x30a]]  ;;  %s2064_s18 = sld [smem:[#allocation5 + $0x30b]] }
  0xb0   :  { %v774_v3 = vrot.slane %v771_v57, 1  ;;  %v826_v8 = vmul.f32 %v1979_v5, %v825_v63  ;;  %v828_v13 = vmul.f32 %v1948_v42, %v827_v9  ;;  %v829_v14 = vstv %s1938_s3  ;;  %s2099_s3 = sld [smem:[#allocation2 + $0x302]] }
  0xb1   :  { %v796_v10 = vadd.f32 %v795_v61, %v794_v58  ;;  %v831_v15 = vstv %s1940_s21  ;;  %v830_v20 = vmul.f32 %v1951_v44, %v829_v14  ;;  %v833_v21 = vstv %s1944_s22  ;;  %s2101_s21 = sld [smem:[#allocation2 + $0x303]]  ;;  %s2107_s22 = sld [smem:[#allocation7 + $0x6]] }
  0xb2   :  { %v776_v16 = vadd.f32 %v774_v3, %v767_v47  ;;  %v832_v7 = vmul.f32 %v1987_v6, %v831_v15  ;;  %v834_v23 = vmul.f32 %v1951_v44, %v833_v21  ;;  %v835_v24 = vstv %s1954_s23  ;;  %s2113_s23 = sld [smem:[#allocation5 + $0x380]] }
  0xb3   :  { %v798_v22 = vrot.slane %v796_v10, 2  ;;  %v837_v25 = vstv %s1956_s1  ;;  %v836_v2 = vmul.f32 %v1965_v53, %v835_v24  ;;  %v839_v29 = vstv %s1960_s0  ;;  %s2115_s1 = sld [smem:[#allocation5 + $0x381]]  ;;  %s2117_s0 = sld [smem:[#allocation5 + $0x382]] }
  0xb4   :  { %v780_v0 = vadd.f32 %v778_v60, %v776_v16  ;;  %v838_v28 = vmul.f32 %v1995_v26, %v837_v25  ;;  %v840_v30 = vmul.f32 %v1965_v53, %v839_v29  ;;  %v841_v32 = vstv %s1962_s24 }
  0xb5   :  { %v843_v33 = vstv %s1971_s25  ;;  %v845_v1 = vstv %s1973_s26  ;;  %v842_v11 = vmul.f32 %v1968_v55, %v841_v32  ;;  %v847_v17 = vadd.f32 %v826_v8, %v824_v4  ;;  %s2122_s26 = sld [smem:[#allocation5 + $0x383]] }
  0xb6   :  { %v781_v12 = vmax.f32 %v1946_v31, %v780_v0  ;;  %v844_v34 = vmul.f32 %v2005_v27, %v843_v33  ;;  %v846_v35 = vmul.f32 %v1968_v55, %v845_v1  ;;  %v849_v18 = vrot.slane %v830_v20, 7 }
  0xb7   :  { %v853_v19 = vrot.slane %v834_v23, 1  ;;  %v856_v36 = vadd.f32 %v838_v28, %v836_v2  ;;  %v858_v38 = vrot.slane %v842_v11, 7  ;;  %v879_v40 = vmul.f32 %v1979_v5, %v823_v62 }
  0xb8   :  { %v785_v37 = vmax.f32 %v781_v12, %v783_v52  ;;  %v862_v39 = vrot.slane %v846_v35, 1  ;;  %v851_v31 = vadd.f32 %v849_v18, %v828_v13  ;;  %v880_v43 = vmul.f32 %v1948_v42, %v825_v63 }
  0xb9   :  { %v855_v41 = vadd.f32 %v853_v19, %v832_v7  ;;  %v881_v45 = vmul.f32 %v1979_v5, %v827_v9  ;;  %v860_v48 = vadd.f32 %v858_v38, %v840_v30  ;;  %v882_v50 = vmul.f32 %v1987_v6, %v829_v14 }
  0xba   :  { %v800_v46 = vadd.f32 %v798_v22, %v785_v37  ;;  %v864_v49 = vadd.f32 %v862_v39, %v844_v34  ;;  %v866_v51 = vrot.slane %v851_v31, 1  ;;  %v883_v54 = vmul.f32 %v1951_v44, %v831_v15 }
  0xbb   :  { %v869_v52 = vadd.f32 %v856_v36, %v855_v41  ;;  %v884_v56 = vmul.f32 %v1987_v6, %v833_v21  ;;  %v885_v58 = vmul.f32 %v1995_v26, %v835_v24  ;;  %v886_v60 = vmul.f32 %v1965_v53, %v837_v25 }
  0xbc   :  { %v802_v47 = vadd.f32 %v801_v59, %v800_v46  ;;  %v871_v57 = vrot.slane %v864_v49, 7  ;;  %v868_v61 = vadd.f32 %v866_v51, %v847_v17  ;;  %v887_v62 = vmul.f32 %v1995_v26, %v839_v29 }
  0xbd   :  { %v888_v63 = vmul.f32 %v2005_v27, %v841_v32  ;;  %v889_v3 = vmul.f32 %v1968_v55, %v843_v33  ;;  %v890_v9 = vmul.f32 %v2005_v27, %v845_v1  ;;  %v892_v10 = vrot.slane %v880_v43, 1 }
  0xbe   :  { %v803_v4 = vmax.f32 %v802_v47, 0.0  ;;  %v873_v8 = vadd.f32 %v871_v57, %v860_v48  ;;  %v874_v59 = vadd.f32 %v869_v52, %v868_v61  ;;  %v896_v13 = vrot.slane %v882_v50, 7 }
  0xbf   :  { %v899_v14 = vadd.f32 %v884_v56, %v883_v54  ;;  %v901_v15 = vrot.slane %v886_v60, 1  ;;  %v894_v20 = vadd.f32 %v892_v10, %v879_v40  ;;  %v905_v7 = vrot.slane %v888_v63, 7 }
  0xc0   :  { %1333 = vst [vmem:[%s2211_s4 + $0x20] sm:$0x3f] %v803_v4  ;;  %v876_v16 = vrot.slane %v873_v8, 1  ;;  %v908_v21 = vadd.f32 %v890_v9, %v889_v3  ;;  %v898_v22 = vadd.f32 %v896_v13, %v881_v45  ;;  %v931_v24 = vstv %s2010_s27  ;;  %s2124_s27 = sld [smem:[#allocation5 + $0x384]] }
  0xc1   :  { %v903_v23 = vadd.f32 %v901_v15, %v885_v58  ;;  %v933_v25 = vstv %s2012_s28  ;;  %v907_v2 = vadd.f32 %v905_v7, %v887_v62  ;;  %v932_v28 = vmul.f32 %v1948_v42, %v931_v24  ;;  %s2128_s28 = sld [smem:[#allocation5 + $0x385]] }
  0xc2   :  { %v878_v0 = vadd.f32 %v876_v16, %v874_v59  ;;  %v934_v29 = vmul.f32 %v1951_v44, %v933_v25  ;;  %v910_v30 = vrot.slane %v898_v22, 1  ;;  %v935_v33 = vstv %s2017_s29  ;;  %s2132_s29 = sld [smem:[#allocation5 + $0x386]] }
  0xc3   :  { %v914_v32 = vrot.slane %v903_v23, 7  ;;  %v937_v1 = vstv %s2019_s30  ;;  %v917_v12 = vadd.f32 %v908_v21, %v907_v2  ;;  %v936_v34 = vmul.f32 %v1965_v53, %v935_v33  ;;  %s2134_s30 = sld [smem:[#allocation5 + $0x387]] }
  0xc4   :  { %v928_v11 = vrot.slane %v878_v0, 1  ;;  %v938_v35 = vmul.f32 %v1968_v55, %v937_v1  ;;  %v912_v17 = vadd.f32 %v910_v30, %v894_v20  ;;  %v939_v19 = vadd.f32 %v934_v29, %v932_v28 }
  0xc5   :  { %v916_v18 = vadd.f32 %v914_v32, %v899_v14  ;;  %v946_v36 = vstv %s2025_s5  ;;  %v923_v37 = vrot.slane %v917_v12, 1  ;;  %v968_v39 = vstv %s2031_s6  ;;  %s2138_s5 = sld [smem:[#allocation5 + $0x388]]  ;;  %s2140_s6 = sld [smem:[#allocation5 + $0x389]] }
  0xc6   :  { %v940_v38 = vadd.f32 %v938_v35, %v936_v34  ;;  %v970_v40 = vstv %s2033_s7  ;;  %v969_v41 = vmul.f32 %v1948_v42, %v968_v39  ;;  %v972_v45 = vstv %s2035_s8  ;;  %s2144_s7 = sld [smem:[#allocation5 + $0x38a]]  ;;  %s2146_s8 = sld [smem:[#allocation5 + $0x38b]] }
  0xc7   :  { %v919_v31 = vrot.slane %v916_v18, 1  ;;  %v971_v43 = vmul.f32 %v1979_v5, %v970_v40  ;;  %v973_v48 = vmul.f32 %v1948_v42, %v972_v45  ;;  %v974_v49 = vstv %s2040_s10  ;;  %s2181_s10 = sld [smem:[#allocation2 + $0x382]] }
  0xc8   :  { %v941_v46 = vadd.f32 %v940_v38, %v939_v19  ;;  %v976_v50 = vstv %s2042_s11  ;;  %v975_v52 = vmul.f32 %v1951_v44, %v974_v49  ;;  %v978_v56 = vstv %s2046_s12  ;;  %s2183_s11 = sld [smem:[#allocation2 + $0x383]] }
  0xc9   :  { %v921_v51 = vadd.f32 %v919_v31, %v912_v17  ;;  %v977_v54 = vmul.f32 %v1987_v6, %v976_v50  ;;  %v979_v57 = vmul.f32 %v1951_v44, %v978_v56  ;;  %v980_v58 = vstv %s2050_s13 }
  0xca   :  { %v943_v47 = vrot.slane %v941_v46, 2  ;;  %v982_v60 = vstv %s2052_s14  ;;  %v981_v62 = vmul.f32 %v1965_v53, %v980_v58  ;;  %v984_v3 = vstv %s2056_s15  ;;  %s1386_s14 = sld [smem:[#allocation7 + $0x7]] }
  0xcb   :  { %v925_v61 = vadd.f32 %v923_v37, %v921_v51  ;;  %v983_v63 = vmul.f32 %v1995_v26, %v982_v60  ;;  %v985_v4 = vmul.f32 %v1965_v53, %v984_v3  ;;  %v986_v8 = vstv %s2058_s16 }
  0xcc   :  { %v988_v9 = vstv %s2062_s17  ;;  %v990_v10 = vstv %s2064_s18  ;;  %v987_v13 = vmul.f32 %v1968_v55, %v986_v8  ;;  %v992_v16 = vadd.f32 %v971_v43, %v969_v41 }
  0xcd   :  { %v926_v59 = vmax.f32 %v878_v0, %v925_v61  ;;  %v989_v14 = vmul.f32 %v2005_v27, %v988_v9  ;;  %v991_v15 = vmul.f32 %v1968_v55, %v990_v10  ;;  %v994_v20 = vrot.slane %v975_v52, 7 }
  0xce   :  { %v998_v7 = vrot.slane %v979_v57, 1  ;;  %v1001_v21 = vadd.f32 %v983_v63, %v981_v62  ;;  %v1003_v23 = vrot.slane %v987_v13, 7  ;;  %v1024_v25 = vmul.f32 %v1979_v5, %v968_v39 }
  0xcf   :  { %v930_v22 = vmax.f32 %v926_v59, %v928_v11  ;;  %v1007_v24 = vrot.slane %v991_v15, 1  ;;  %v996_v0 = vadd.f32 %v994_v20, %v973_v48  ;;  %v1025_v28 = vmul.f32 %v1948_v42, %v970_v40 }
  0xd0   :  { %v1000_v2 = vadd.f32 %v998_v7, %v977_v54  ;;  %v1026_v29 = vmul.f32 %v1979_v5, %v972_v45  ;;  %v1005_v32 = vadd.f32 %v1003_v23, %v985_v4  ;;  %v1027_v1 = vmul.f32 %v1987_v6, %v974_v49 }
  0xd1   :  { %v945_v30 = vadd.f32 %v943_v47, %v930_v22  ;;  %v1009_v33 = vadd.f32 %v1007_v24, %v989_v14  ;;  %v1011_v12 = vrot.slane %v996_v0, 1  ;;  %v1028_v34 = vmul.f32 %v1951_v44, %v976_v50 }
  0xd2   :  { %v1014_v11 = vadd.f32 %v1001_v21, %v1000_v2  ;;  %v1029_v35 = vmul.f32 %v1987_v6, %v978_v56  ;;  %v1030_v19 = vmul.f32 %v1995_v26, %v980_v58  ;;  %v1031_v37 = vmul.f32 %v1965_v53, %v982_v60 }
  0xd3   :  { %v947_v17 = vadd.f32 %v946_v36, %v945_v30  ;;  %v1016_v18 = vrot.slane %v1009_v33, 7  ;;  %v1013_v38 = vadd.f32 %v1011_v12, %v992_v16  ;;  %v1032_v39 = vmul.f32 %v1995_v26, %v984_v3 }
  0xd4   :  { %v1033_v40 = vmul.f32 %v2005_v27, %v986_v8  ;;  %v1034_v31 = vmul.f32 %v1968_v55, %v988_v9  ;;  %v1035_v45 = vmul.f32 %v2005_v27, %v990_v10  ;;  %v1037_v46 = vrot.slane %v1025_v28, 1 }
  0xd5   :  { %v948_v41 = vmax.f32 %v947_v17, 0.0  ;;  %v1018_v43 = vadd.f32 %v1016_v18, %v1005_v32  ;;  %v1019_v36 = vadd.f32 %v1014_v11, %v1013_v38  ;;  %v1041_v48 = vrot.slane %v1027_v1, 7 }
  0xd6   :  { %v1044_v49 = vadd.f32 %v1029_v35, %v1028_v34  ;;  %v1046_v50 = vrot.slane %v1031_v37, 1  ;;  %v1039_v52 = vadd.f32 %v1037_v46, %v1024_v25  ;;  %v1050_v54 = vrot.slane %v1033_v40, 7 }
  0xd7   :  { %1351 = vst [vmem:[%s2211_s4 + $0x28] sm:$0x3f] %v948_v41  ;;  %v1021_v51 = vrot.slane %v1018_v43, 1  ;;  %v1053_v56 = vadd.f32 %v1035_v45, %v1034_v31  ;;  %v1043_v47 = vadd.f32 %v1041_v48, %v1026_v29  ;;  %v1076_v58 = vstv %s2092_s19 }
  0xd8   :  { %v1048_v57 = vadd.f32 %v1046_v50, %v1030_v19  ;;  %v1078_v60 = vstv %s2094_s20  ;;  %v1052_v62 = vadd.f32 %v1050_v54, %v1032_v39  ;;  %v1077_v63 = vmul.f32 %v1948_v42, %v1076_v58 }
  0xd9   :  { %v1023_v61 = vadd.f32 %v1021_v51, %v1019_v36  ;;  %v1079_v3 = vmul.f32 %v1951_v44, %v1078_v60  ;;  %v1055_v4 = vrot.slane %v1043_v47, 1  ;;  %v1080_v9 = vstv %s2099_s3 }
  0xda   :  { %v1059_v8 = vrot.slane %v1048_v57, 7  ;;  %v1082_v10 = vstv %s2101_s21  ;;  %v1062_v59 = vadd.f32 %v1053_v56, %v1052_v62  ;;  %v1081_v14 = vmul.f32 %v1965_v53, %v1080_v9 }
  0xdb   :  { %v1073_v13 = vrot.slane %v1023_v61, 1  ;;  %v1083_v15 = vmul.f32 %v1968_v55, %v1082_v10  ;;  %v1057_v16 = vadd.f32 %v1055_v4, %v1039_v52  ;;  %v1084_v7 = vadd.f32 %v1079_v3, %v1077_v63 }
  0xdc   :  { %v1061_v20 = vadd.f32 %v1059_v8, %v1044_v49  ;;  %v1091_v21 = vstv %s2107_s22  ;;  %v1068_v22 = vrot.slane %v1062_v59, 1  ;;  %v1113_v24 = vstv %s2113_s23 }
  0xdd   :  { %v1085_v23 = vadd.f32 %v1083_v15, %v1081_v14  ;;  %v1115_v25 = vstv %s2115_s1  ;;  %v1114_v2 = vmul.f32 %v1948_v42, %v1113_v24  ;;  %v1117_v29 = vstv %s2117_s0 }
  0xde   :  { %v1064_v0 = vrot.slane %v1061_v20, 1  ;;  %v1116_v28 = vmul.f32 %v1979_v5, %v1115_v25  ;;  %v1118_v32 = vmul.f32 %v1948_v42, %v1117_v29  ;;  %v1119_v33 = vstv %s2122_s26 }
  0xdf   :  { %v1086_v30 = vadd.f32 %v1085_v23, %v1084_v7  ;;  %v1121_v1 = vstv %s2124_s27  ;;  %v1120_v11 = vmul.f32 %v1951_v44, %v1119_v33  ;;  %v1123_v35 = vstv %s2128_s28 }
  0xe0   :  { %v1066_v12 = vadd.f32 %v1064_v0, %v1057_v16  ;;  %v1122_v34 = vmul.f32 %v1987_v6, %v1121_v1  ;;  %v1124_v18 = vmul.f32 %v1951_v44, %v1123_v35  ;;  %v1125_v19 = vstv %s2132_s29 }
  0xe1   :  { %v1088_v17 = vrot.slane %v1086_v30, 2  ;;  %v1127_v37 = vstv %s2134_s30  ;;  %v1126_v39 = vmul.f32 %v1965_v53, %v1125_v19  ;;  %v1129_v31 = vstv %s2138_s5 }
  0xe2   :  { %v1070_v38 = vadd.f32 %v1068_v22, %v1066_v12  ;;  %v1128_v40 = vmul.f32 %v1995_v26, %v1127_v37  ;;  %v1130_v41 = vmul.f32 %v1965_v53, %v1129_v31  ;;  %v1131_v43 = vstv %s2140_s6 }
  0xe3   :  { %v1133_v45 = vstv %s2144_s7  ;;  %v1135_v46 = vstv %s2146_s8  ;;  %v1132_v48 = vmul.f32 %v1968_v55, %v1131_v43  ;;  %v1137_v51 = vadd.f32 %v1116_v28, %v1114_v2 }
  0xe4   :  { %v1071_v36 = vmax.f32 %v1023_v61, %v1070_v38  ;;  %v1134_v49 = vmul.f32 %v2005_v27, %v1133_v45  ;;  %v1136_v50 = vmul.f32 %v1968_v55, %v1135_v46  ;;  %v1139_v52 = vrot.slane %v1120_v11, 7 }
  0xe5   :  { %v1143_v54 = vrot.slane %v1124_v18, 1  ;;  %v1146_v56 = vadd.f32 %v1128_v40, %v1126_v39  ;;  %v1148_v57 = vrot.slane %v1132_v48, 7  ;;  %v1169_v60 = vmul.f32 %v1979_v5, %v1113_v24 }
  0xe6   :  { %v1075_v47 = vmax.f32 %v1071_v36, %v1073_v13  ;;  %v1152_v58 = vrot.slane %v1136_v50, 1  ;;  %v1141_v61 = vadd.f32 %v1139_v52, %v1118_v32  ;;  %v1170_v63 = vmul.f32 %v1948_v42, %v1115_v25 }
  0xe7   :  { %v1145_v62 = vadd.f32 %v1143_v54, %v1122_v34  ;;  %v1171_v3 = vmul.f32 %v1979_v5, %v1117_v29  ;;  %v1150_v8 = vadd.f32 %v1148_v57, %v1130_v41  ;;  %v1172_v10 = vmul.f32 %v1987_v6, %v1119_v33 }
  0xe8   :  { %v1090_v4 = vadd.f32 %v1088_v17, %v1075_v47  ;;  %v1154_v9 = vadd.f32 %v1152_v58, %v1134_v49  ;;  %v1156_v59 = vrot.slane %v1141_v61, 1  ;;  %v1173_v14 = vmul.f32 %v1951_v44, %v1121_v1 }
  0xe9   :  { %v1159_v13 = vadd.f32 %v1146_v56, %v1145_v62  ;;  %v1174_v15 = vmul.f32 %v1987_v6, %v1123_v35  ;;  %v1175_v7 = vmul.f32 %v1995_v26, %v1125_v19  ;;  %v1176_v5 = vmul.f32 %v1965_v53, %v1127_v37 }
  0xea   :  { %v1092_v16 = vadd.f32 %v1091_v21, %v1090_v4  ;;  %v1161_v20 = vrot.slane %v1154_v9, 7  ;;  %v1158_v22 = vadd.f32 %v1156_v59, %v1137_v51  ;;  %v1177_v23 = vmul.f32 %v1995_v26, %v1129_v31 }
  0xeb   :  { %v1178_v24 = vmul.f32 %v2005_v27, %v1131_v43  ;;  %v1179_v25 = vmul.f32 %v1968_v55, %v1133_v45  ;;  %v1180_v28 = vmul.f32 %v2005_v27, %v1135_v46  ;;  %v1182_v6 = vrot.slane %v1170_v63, 1 }
  0xec   :  { %v1093_v0 = vmax.f32 %v1092_v16, 0.0  ;;  %v1163_v2 = vadd.f32 %v1161_v20, %v1150_v8  ;;  %v1164_v21 = vadd.f32 %v1159_v13, %v1158_v22  ;;  %v1186_v29 = vrot.slane %v1172_v10, 7 }
  0xed   :  { %v1191_v30 = vrot.slane %v1176_v5, 1  ;;  %v1184_v26 = vadd.f32 %v1182_v6, %v1169_v60  ;;  %v1189_v32 = vadd.f32 %v1174_v15, %v1173_v14  ;;  %v1195_v33 = vrot.slane %v1178_v24, 7 }
  0xee   :  { %1369 = vst [vmem:[%s2211_s4 + $0x30] sm:$0x3f] %v1093_v0  ;;  %v1198_v1 = vadd.f32 %v1180_v28, %v1179_v25  ;;  %v1188_v12 = vadd.f32 %v1186_v29, %v1171_v3  ;;  %v1221_v34 = vstv %s2174_s2  ;;  %v1223_v35 = vstv %s2176_s9 }
  0xef   :  { %v1193_v11 = vadd.f32 %v1191_v30, %v1175_v7  ;;  %v1166_v17 = vrot.slane %v1163_v2, 1  ;;  %v1197_v27 = vadd.f32 %v1195_v33, %v1177_v23  ;;  %v1222_v18 = vmul.f32 %v1948_v42, %v1221_v34 }
  0xf0   :  { %v1224_v19 = vmul.f32 %v1951_v44, %v1223_v35  ;;  %v1200_v37 = vrot.slane %v1188_v12, 1  ;;  %v1225_v39 = vstv %s2181_s10  ;;  %v1227_v40 = vstv %s2183_s11 }
  0xf1   :  { %v1204_v38 = vrot.slane %v1193_v11, 7  ;;  %v1207_v31 = vadd.f32 %v1198_v1, %v1197_v27  ;;  %v1226_v41 = vmul.f32 %v1965_v53, %v1225_v39  ;;  %v1228_v43 = vmul.f32 %v1968_v55, %v1227_v40 }
  0xf2   :  { %v1202_v45 = vadd.f32 %v1200_v37, %v1184_v26  ;;  %v1229_v36 = vadd.f32 %v1224_v19, %v1222_v18  ;;  %v1168_v49 = vadd.f32 %v1166_v17, %v1164_v21  ;;  %v1236_v58 = vstv %s1386_s14 }
  0xf3   :  { %v1206_v46 = vadd.f32 %v1204_v38, %v1189_v32  ;;  %v1230_v48 = vadd.f32 %v1228_v43, %v1226_v41  ;;  %v1213_v51 = vrot.slane %v1207_v31, 1 }
  0xf4   :  { %v1218_v54 = vrot.slane %v1168_v49, 1 }
  0xf5   :  { %v1209_v50 = vrot.slane %v1206_v46, 1  ;;  %v1231_v52 = vadd.f32 %v1230_v48, %v1229_v36 }
  0xf7   :  { %v1211_v42 = vadd.f32 %v1209_v50, %v1202_v45  ;;  %v1233_v47 = vrot.slane %v1231_v52, 2 }
  0xf9   :  { %v1215_v44 = vadd.f32 %v1213_v51, %v1211_v42 }
  0xfb   :  { %v1216_v56 = vmax.f32 %v1168_v49, %v1215_v44 }
  0xfd   :  { %v1220_v57 = vmax.f32 %v1216_v56, %v1218_v54 }
  0xff   :  { %v1235_v60 = vadd.f32 %v1233_v47, %v1220_v57 }
 0x101   :  { %v1237_v53 = vadd.f32 %v1236_v58, %v1235_v60 }
 0x103   :  { %v1238_v61 = vmax.f32 %v1237_v53, 0.0 }
 0x105   :  { %1387 = vst [vmem:[%s2211_s4 + $0x38] sm:$0x3f] %v1238_v61 }
 0x106   :  { %1245 = vsyncpa [#allocation3], 1 }
 0x107   :  { %1246 = vsyncpa [#allocation4], 1 }
 0x108   :  { %1247 = vsyncpa [#allocation6], 1 }

</bundles_post_ra>
